<compile_context>
chip_gen: v7x
topology: tpu7x:2x2x1
jax: 0.10.0
libtpu: 0.0.40
codegen_flags: <defaults>
</compile_context>

<pallas_src>
import jax
import jax.numpy as jnp
from jax.experimental import pallas as pl
from jax.experimental.pallas import tpu as pltpu


def _lstm2_fc_kernel(x_ref, wih0_ref, b0_ref, whh0_ref, wih1_ref, whh1_ref,
                     b1_ref, wfc_ref, bfc_ref, out_ref):
    """Two stacked LSTM layers unrolled over time + final linear projection.

    x_ref:    (T*B, I)   time-major input (row t*B+b = x[b, t])
    wih0_ref: (I, 4H)    layer-0 input weights
    b0_ref:   (1, 4H)    b_ih0 + b_hh0
    whh0_ref: (H, 4H)    layer-0 recurrent weights
    wih1_ref: (H, 4H)    layer-1 input weights (input = layer-0 hidden)
    whh1_ref: (H, 4H)    layer-1 recurrent weights
    b1_ref:   (1, 4H)    b_ih1 + b_hh1
    wfc_ref:  (H, C)     bfc_ref: (1, C)
    out_ref:  (B, C)
    """
    TB = x_ref.shape[0]
    H4 = wih0_ref.shape[1]
    H = H4 // 4
    B = out_ref.shape[0]
    T = TB // B

    # ---- Prologue: layer-0 input projection for all timesteps in one MXU push.
    gx0 = (jnp.dot(x_ref[...].astype(jnp.bfloat16),
                   wih0_ref[...].astype(jnp.bfloat16),
                   preferred_element_type=jnp.float32)
           + b0_ref[...])                                       # (T*B, 4H) f32

    # Small recurrent weights, loaded once as bf16 (2 vregs each).
    whh0 = whh0_ref[...].astype(jnp.bfloat16)                   # (H, 4H)
    wih1 = wih1_ref[...].astype(jnp.bfloat16)                   # (H, 4H)
    whh1 = whh1_ref[...].astype(jnp.bfloat16)                   # (H, 4H)
    b1 = b1_ref[...]                                            # (1, 4H), broadcast at use

    def act(g):
        # One full-vreg sigmoid + one full-vreg tanh (2 EUP pushes per layer),
        # gates sliced afterwards instead of 4 sliced nonlinearities.
        sg = jax.nn.sigmoid(g)
        tg = jnp.tanh(g)
        return sg[:, 0:H], sg[:, H:2 * H], tg[:, 2 * H:3 * H], sg[:, 3 * H:4 * H]

    zeros = jnp.zeros((B, H), jnp.float32)
    h0, c0, h1, c1 = zeros, zeros, zeros, zeros
    # Recurrent gate contributions from the *previous* step's hidden states.
    # Zero at t=0 since the initial hidden states are zero.
    rec0 = jnp.zeros((B, H4), jnp.float32)                      # h0_{t-1} @ Whh0
    rec1 = jnp.zeros((B, H4), jnp.float32)                      # h1_{t-1} @ Whh1

    # Fully-unrolled time loop: T is small and static, every slice is static and
    # the scheduler sees across iterations (layer-0 of step t+1 can issue while
    # layer-1 of step t is still in its EUP/VPU chain).
    for t in range(T):
        # ---- Layer 0 (depends only on h0_{t-1} via rec0).
        g0 = gx0[t * B:(t + 1) * B, :] + rec0
        i0, f0, gg0, o0 = act(g0)
        c0 = f0 * c0 + i0 * gg0
        h0 = o0 * jnp.tanh(c0)
        h0_bf = h0.astype(jnp.bfloat16)

        if t + 1 < T:
            # Next step's layer-0 recurrent term: ready as soon as h0_t exists,
            # off this step's layer-1 critical path.
            rec0 = jnp.dot(h0_bf, whh0, preferred_element_type=jnp.float32)

        # ---- Layer 1 (serial dependency on this step's h0 only; rec1 is from
        # the previous iteration).
        g1 = (jnp.dot(h0_bf, wih1, preferred_element_type=jnp.float32)
              + rec1 + b1)
        i1, f1, gg1, o1 = act(g1)
        c1 = f1 * c1 + i1 * gg1
        h1 = o1 * jnp.tanh(c1)

        if t + 1 < T:
            # Next step's layer-1 recurrent term (off-path filler).
            rec1 = jnp.dot(h1.astype(jnp.bfloat16), whh1,
                           preferred_element_type=jnp.float32)

    # ---- fc(hn[-1]): final hidden state of the last layer -> (B, C).
    out_ref[...] = (jnp.dot(h1.astype(jnp.bfloat16),
                            wfc_ref[...].astype(jnp.bfloat16),
                            preferred_element_type=jnp.float32)
                    + bfc_ref[...])


def eeg_rnn_forward(x, params):
    """x: (B, T, I) float32 (batch_first, like PyTorch). Returns (B, C)."""
    B, T, I = x.shape
    H = params["whh0"].shape[0]
    C = params["wfc"].shape[1]

    # Tiny time-major flatten (1 KiB); the input projection itself happens
    # inside the kernel prologue.
    x_tm = jnp.transpose(x, (1, 0, 2)).reshape(T * B, I)

    vspec = pl.BlockSpec(memory_space=pltpu.MemorySpace.VMEM)
    # TODO(synk): for large batches add a leading "parallel" grid axis over
    # batch tiles (uses v7x's second TensorCore and bounds VMEM); at B=2 a
    # single grid-less invocation is the right shape.
    return pl.pallas_call(
        _lstm2_fc_kernel,
        out_shape=jax.ShapeDtypeStruct((B, C), jnp.float32),
        in_specs=[vspec] * 9,
        out_specs=vspec,
    )(x_tm, params["wih0"], params["b0"], params["whh0"],
      params["wih1"], params["whh1"], params["b1"],
      params["wfc"], params["bfc"])


def _reference(x, params):
    """Pure-JAX reference of the same recurrence (PyTorch LSTM semantics),
    using the same bf16-operand / f32-accumulation matmul policy as the kernel."""
    B, T, _ = x.shape
    H = params["whh0"].shape[0]

    def mm(a, w):
        return jnp.dot(a.astype(jnp.bfloat16), w.astype(jnp.bfloat16),
                       preferred_element_type=jnp.float32)

    def cell(gin, h, c, whh):
        g = gin + mm(h, whh)
        i = jax.nn.sigmoid(g[:, :H])
        f = jax.nn.sigmoid(g[:, H:2 * H])
        gg = jnp.tanh(g[:, 2 * H:3 * H])
        o = jax.nn.sigmoid(g[:, 3 * H:])
        c = f * c + i * gg
        h = o * jnp.tanh(c)
        return h, c

    h0 = c0 = h1 = c1 = jnp.zeros((B, H), jnp.float32)
    for t in range(T):
        g0in = mm(x[:, t], params["wih0"]) + params["b0"]
        h0, c0 = cell(g0in, h0, c0, params["whh0"])
        g1in = mm(h0, params["wih1"]) + params["b1"]
        h1, c1 = cell(g1in, h1, c1, params["whh1"])
    return mm(h1, params["wfc"]) + params["bfc"]


if __name__ == "__main__":
    # Small shapes consistent with the module: input_size=16, hidden=32,
    # num_layers=2, num_classes=2, batch=2, seq=8.
    B, T, I, H, C = 2, 8, 16, 32, 2

    key = jax.random.PRNGKey(0)
    keys = jax.random.split(key, 11)
    bound = 1.0 / jnp.sqrt(jnp.float32(H))

    def u(k, shape):
        return jax.random.uniform(k, shape, jnp.float32, -bound, bound)

    # Weights stored pre-transposed ((in, 4H)); biases pre-summed (b_ih + b_hh)
    # once at init time, never per forward call.
    params = {
        "wih0": u(keys[0], (I, 4 * H)),
        "whh0": u(keys[1], (H, 4 * H)),
        "b0":   u(keys[2], (1, 4 * H)) + u(keys[3], (1, 4 * H)),
        "wih1": u(keys[4], (H, 4 * H)),
        "whh1": u(keys[5], (H, 4 * H)),
        "b1":   u(keys[6], (1, 4 * H)) + u(keys[7], (1, 4 * H)),
        "wfc":  u(keys[8], (H, C)),
        "bfc":  u(keys[9], (1, C)),
    }

    x = jax.random.normal(keys[10], (B, T, I), jnp.float32)

    out = eeg_rnn_forward(x, params)
    out = jax.block_until_ready(out)

    ref = _reference(x, params)
    assert out.shape == (B, C)
    assert jnp.allclose(out, ref, atol=1e-2, rtol=1e-2), (out, ref)

    print("KERNEL_OK")
</pallas_src>

<mosaic_0001>
module attributes {stable_mosaic.version = 11 : i64} {
  func.func @_lstm2_fc_kernel(%arg0: memref<16x16xf32, #tpu.memory_space<vmem>>, %arg1: memref<16x128xf32, #tpu.memory_space<vmem>>, %arg2: memref<1x128xf32, #tpu.memory_space<vmem>>, %arg3: memref<32x128xf32, #tpu.memory_space<vmem>>, %arg4: memref<32x128xf32, #tpu.memory_space<vmem>>, %arg5: memref<32x128xf32, #tpu.memory_space<vmem>>, %arg6: memref<1x128xf32, #tpu.memory_space<vmem>>, %arg7: memref<32x2xf32, #tpu.memory_space<vmem>>, %arg8: memref<1x2xf32, #tpu.memory_space<vmem>>, %arg9: memref<2x2xf32, #tpu.memory_space<vmem>>) attributes {dimension_semantics = [], scalar_prefetch = 0 : i64, scratch_operands = 0 : i64, tpu.core_type = #tpu.core_type<tc>} {
    %c0 = arith.constant 0 : index
    %c0_0 = arith.constant 0 : index
    %0 = vector.load %arg0[%c0, %c0_0] : memref<16x16xf32, #tpu.memory_space<vmem>>, vector<16x16xf32>
    %1 = arith.truncf %0 : vector<16x16xf32> to vector<16x16xbf16>
    %c0_1 = arith.constant 0 : index
    %c0_2 = arith.constant 0 : index
    %2 = vector.load %arg1[%c0_1, %c0_2] : memref<16x128xf32, #tpu.memory_space<vmem>>, vector<16x128xf32>
    %3 = arith.truncf %2 : vector<16x128xf32> to vector<16x128xbf16>
    %cst = arith.constant dense<0.000000e+00> : vector<16x128xf32>
    %4 = tpu.matmul %1, %3, %cst {dimension_numbers = #tpu.dot_dimension_numbers<[1], [0], [0], [1], [0, 0, 1, 1], [], []>} : vector<16x16xbf16>, vector<16x128xbf16>, vector<16x128xf32> -> vector<16x128xf32>
    %c0_3 = arith.constant 0 : index
    %c0_4 = arith.constant 0 : index
    %5 = vector.load %arg2[%c0_3, %c0_4] : memref<1x128xf32, #tpu.memory_space<vmem>>, vector<1x128xf32>
    %6 = vector.broadcast %5 : vector<1x128xf32> to vector<16x128xf32>
    %7 = arith.addf %4, %6 : vector<16x128xf32>
    %c0_5 = arith.constant 0 : index
    %c0_6 = arith.constant 0 : index
    %8 = vector.load %arg3[%c0_5, %c0_6] : memref<32x128xf32, #tpu.memory_space<vmem>>, vector<32x128xf32>
    %9 = arith.truncf %8 : vector<32x128xf32> to vector<32x128xbf16>
    %c0_7 = arith.constant 0 : index
    %c0_8 = arith.constant 0 : index
    %10 = vector.load %arg4[%c0_7, %c0_8] : memref<32x128xf32, #tpu.memory_space<vmem>>, vector<32x128xf32>
    %11 = arith.truncf %10 : vector<32x128xf32> to vector<32x128xbf16>
    %c0_9 = arith.constant 0 : index
    %c0_10 = arith.constant 0 : index
    %12 = vector.load %arg5[%c0_9, %c0_10] : memref<32x128xf32, #tpu.memory_space<vmem>>, vector<32x128xf32>
    %13 = arith.truncf %12 : vector<32x128xf32> to vector<32x128xbf16>
    %c0_11 = arith.constant 0 : index
    %c0_12 = arith.constant 0 : index
    %14 = vector.load %arg6[%c0_11, %c0_12] : memref<1x128xf32, #tpu.memory_space<vmem>>, vector<1x128xf32>
    %cst_13 = arith.constant 0.000000e+00 : f32
    %15 = vector.broadcast %cst_13 : f32 to vector<2x32xf32>
    %cst_14 = arith.constant 0.000000e+00 : f32
    %16 = vector.broadcast %cst_14 : f32 to vector<2x128xf32>
    %cst_15 = arith.constant 0.000000e+00 : f32
    %17 = vector.broadcast %cst_15 : f32 to vector<2x128xf32>
    %18 = vector.extract_strided_slice %7 {offsets = [0, 0], sizes = [2, 128], strides = [1, 1]} : vector<16x128xf32> to vector<2x128xf32>
    %19 = arith.addf %18, %16 : vector<2x128xf32>
    %20 = arith.negf %19 : vector<2x128xf32>
    %21 = math.exp %20 : vector<2x128xf32>
    %cst_16 = arith.constant 1.000000e+00 : f32
    %22 = vector.broadcast %cst_16 : f32 to vector<2x128xf32>
    %23 = arith.addf %22, %21 : vector<2x128xf32>
    %24 = arith.divf %22, %23 : vector<2x128xf32>
    %25 = math.tanh %19 : vector<2x128xf32>
    %26 = vector.extract_strided_slice %24 {offsets = [0, 0], sizes = [2, 32], strides = [1, 1]} : vector<2x128xf32> to vector<2x32xf32>
    %27 = vector.extract_strided_slice %24 {offsets = [0, 32], sizes = [2, 32], strides = [1, 1]} : vector<2x128xf32> to vector<2x32xf32>
    %28 = vector.extract_strided_slice %25 {offsets = [0, 64], sizes = [2, 32], strides = [1, 1]} : vector<2x128xf32> to vector<2x32xf32>
    %29 = vector.extract_strided_slice %24 {offsets = [0, 96], sizes = [2, 32], strides = [1, 1]} : vector<2x128xf32> to vector<2x32xf32>
    %30 = arith.mulf %27, %15 : vector<2x32xf32>
    %31 = arith.mulf %26, %28 : vector<2x32xf32>
    %32 = arith.addf %30, %31 : vector<2x32xf32>
    %33 = math.tanh %32 : vector<2x32xf32>
    %34 = arith.mulf %29, %33 : vector<2x32xf32>
    %35 = arith.truncf %34 : vector<2x32xf32> to vector<2x32xbf16>
    %cst_17 = arith.constant dense<0.000000e+00> : vector<2x128xf32>
    %36 = tpu.matmul %35, %9, %cst_17 {dimension_numbers = #tpu.dot_dimension_numbers<[1], [0], [0], [1], [0, 0, 1, 1], [], []>} : vector<2x32xbf16>, vector<32x128xbf16>, vector<2x128xf32> -> vector<2x128xf32>
    %cst_18 = arith.constant dense<0.000000e+00> : vector<2x128xf32>
    %37 = tpu.matmul %35, %11, %cst_18 {dimension_numbers = #tpu.dot_dimension_numbers<[1], [0], [0], [1], [0, 0, 1, 1], [], []>} : vector<2x32xbf16>, vector<32x128xbf16>, vector<2x128xf32> -> vector<2x128xf32>
    %38 = arith.addf %37, %17 : vector<2x128xf32>
    %39 = vector.broadcast %14 : vector<1x128xf32> to vector<2x128xf32>
    %40 = arith.addf %38, %39 : vector<2x128xf32>
    %41 = arith.negf %40 : vector<2x128xf32>
    %42 = math.exp %41 : vector<2x128xf32>
    %cst_19 = arith.constant 1.000000e+00 : f32
    %43 = vector.broadcast %cst_19 : f32 to vector<2x128xf32>
    %44 = arith.addf %43, %42 : vector<2x128xf32>
    %45 = arith.divf %43, %44 : vector<2x128xf32>
    %46 = math.tanh %40 : vector<2x128xf32>
    %47 = vector.extract_strided_slice %45 {offsets = [0, 0], sizes = [2, 32], strides = [1, 1]} : vector<2x128xf32> to vector<2x32xf32>
    %48 = vector.extract_strided_slice %45 {offsets = [0, 32], sizes = [2, 32], strides = [1, 1]} : vector<2x128xf32> to vector<2x32xf32>
    %49 = vector.extract_strided_slice %46 {offsets = [0, 64], sizes = [2, 32], strides = [1, 1]} : vector<2x128xf32> to vector<2x32xf32>
    %50 = vector.extract_strided_slice %45 {offsets = [0, 96], sizes = [2, 32], strides = [1, 1]} : vector<2x128xf32> to vector<2x32xf32>
    %51 = arith.mulf %48, %15 : vector<2x32xf32>
    %52 = arith.mulf %47, %49 : vector<2x32xf32>
    %53 = arith.addf %51, %52 : vector<2x32xf32>
    %54 = math.tanh %53 : vector<2x32xf32>
    %55 = arith.mulf %50, %54 : vector<2x32xf32>
    %56 = arith.truncf %55 : vector<2x32xf32> to vector<2x32xbf16>
    %cst_20 = arith.constant dense<0.000000e+00> : vector<2x128xf32>
    %57 = tpu.matmul %56, %13, %cst_20 {dimension_numbers = #tpu.dot_dimension_numbers<[1], [0], [0], [1], [0, 0, 1, 1], [], []>} : vector<2x32xbf16>, vector<32x128xbf16>, vector<2x128xf32> -> vector<2x128xf32>
    %58 = vector.extract_strided_slice %7 {offsets = [2, 0], sizes = [2, 128], strides = [1, 1]} : vector<16x128xf32> to vector<2x128xf32>
    %59 = arith.addf %58, %36 : vector<2x128xf32>
    %60 = arith.negf %59 : vector<2x128xf32>
    %61 = math.exp %60 : vector<2x128xf32>
    %cst_21 = arith.constant 1.000000e+00 : f32
    %62 = vector.broadcast %cst_21 : f32 to vector<2x128xf32>
    %63 = arith.addf %62, %61 : vector<2x128xf32>
    %64 = arith.divf %62, %63 : vector<2x128xf32>
    %65 = math.tanh %59 : vector<2x128xf32>
    %66 = vector.extract_strided_slice %64 {offsets = [0, 0], sizes = [2, 32], strides = [1, 1]} : vector<2x128xf32> to vector<2x32xf32>
    %67 = vector.extract_strided_slice %64 {offsets = [0, 32], sizes = [2, 32], strides = [1, 1]} : vector<2x128xf32> to vector<2x32xf32>
    %68 = vector.extract_strided_slice %65 {offsets = [0, 64], sizes = [2, 32], strides = [1, 1]} : vector<2x128xf32> to vector<2x32xf32>
    %69 = vector.extract_strided_slice %64 {offsets = [0, 96], sizes = [2, 32], strides = [1, 1]} : vector<2x128xf32> to vector<2x32xf32>
    %70 = arith.mulf %67, %32 : vector<2x32xf32>
    %71 = arith.mulf %66, %68 : vector<2x32xf32>
    %72 = arith.addf %70, %71 : vector<2x32xf32>
    %73 = math.tanh %72 : vector<2x32xf32>
    %74 = arith.mulf %69, %73 : vector<2x32xf32>
    %75 = arith.truncf %74 : vector<2x32xf32> to vector<2x32xbf16>
    %cst_22 = arith.constant dense<0.000000e+00> : vector<2x128xf32>
    %76 = tpu.matmul %75, %9, %cst_22 {dimension_numbers = #tpu.dot_dimension_numbers<[1], [0], [0], [1], [0, 0, 1, 1], [], []>} : vector<2x32xbf16>, vector<32x128xbf16>, vector<2x128xf32> -> vector<2x128xf32>
    %cst_23 = arith.constant dense<0.000000e+00> : vector<2x128xf32>
    %77 = tpu.matmul %75, %11, %cst_23 {dimension_numbers = #tpu.dot_dimension_numbers<[1], [0], [0], [1], [0, 0, 1, 1], [], []>} : vector<2x32xbf16>, vector<32x128xbf16>, vector<2x128xf32> -> vector<2x128xf32>
    %78 = arith.addf %77, %57 : vector<2x128xf32>
    %79 = vector.broadcast %14 : vector<1x128xf32> to vector<2x128xf32>
    %80 = arith.addf %78, %79 : vector<2x128xf32>
    %81 = arith.negf %80 : vector<2x128xf32>
    %82 = math.exp %81 : vector<2x128xf32>
    %cst_24 = arith.constant 1.000000e+00 : f32
    %83 = vector.broadcast %cst_24 : f32 to vector<2x128xf32>
    %84 = arith.addf %83, %82 : vector<2x128xf32>
    %85 = arith.divf %83, %84 : vector<2x128xf32>
    %86 = math.tanh %80 : vector<2x128xf32>
    %87 = vector.extract_strided_slice %85 {offsets = [0, 0], sizes = [2, 32], strides = [1, 1]} : vector<2x128xf32> to vector<2x32xf32>
    %88 = vector.extract_strided_slice %85 {offsets = [0, 32], sizes = [2, 32], strides = [1, 1]} : vector<2x128xf32> to vector<2x32xf32>
    %89 = vector.extract_strided_slice %86 {offsets = [0, 64], sizes = [2, 32], strides = [1, 1]} : vector<2x128xf32> to vector<2x32xf32>
    %90 = vector.extract_strided_slice %85 {offsets = [0, 96], sizes = [2, 32], strides = [1, 1]} : vector<2x128xf32> to vector<2x32xf32>
    %91 = arith.mulf %88, %53 : vector<2x32xf32>
    %92 = arith.mulf %87, %89 : vector<2x32xf32>
    %93 = arith.addf %91, %92 : vector<2x32xf32>
    %94 = math.tanh %93 : vector<2x32xf32>
    %95 = arith.mulf %90, %94 : vector<2x32xf32>
    %96 = arith.truncf %95 : vector<2x32xf32> to vector<2x32xbf16>
    %cst_25 = arith.constant dense<0.000000e+00> : vector<2x128xf32>
    %97 = tpu.matmul %96, %13, %cst_25 {dimension_numbers = #tpu.dot_dimension_numbers<[1], [0], [0], [1], [0, 0, 1, 1], [], []>} : vector<2x32xbf16>, vector<32x128xbf16>, vector<2x128xf32> -> vector<2x128xf32>
    %98 = vector.extract_strided_slice %7 {offsets = [4, 0], sizes = [2, 128], strides = [1, 1]} : vector<16x128xf32> to vector<2x128xf32>
    %99 = arith.addf %98, %76 : vector<2x128xf32>
    %100 = arith.negf %99 : vector<2x128xf32>
    %101 = math.exp %100 : vector<2x128xf32>
    %cst_26 = arith.constant 1.000000e+00 : f32
    %102 = vector.broadcast %cst_26 : f32 to vector<2x128xf32>
    %103 = arith.addf %102, %101 : vector<2x128xf32>
    %104 = arith.divf %102, %103 : vector<2x128xf32>
    %105 = math.tanh %99 : vector<2x128xf32>
    %106 = vector.extract_strided_slice %104 {offsets = [0, 0], sizes = [2, 32], strides = [1, 1]} : vector<2x128xf32> to vector<2x32xf32>
    %107 = vector.extract_strided_slice %104 {offsets = [0, 32], sizes = [2, 32], strides = [1, 1]} : vector<2x128xf32> to vector<2x32xf32>
    %108 = vector.extract_strided_slice %105 {offsets = [0, 64], sizes = [2, 32], strides = [1, 1]} : vector<2x128xf32> to vector<2x32xf32>
    %109 = vector.extract_strided_slice %104 {offsets = [0, 96], sizes = [2, 32], strides = [1, 1]} : vector<2x128xf32> to vector<2x32xf32>
    %110 = arith.mulf %107, %72 : vector<2x32xf32>
    %111 = arith.mulf %106, %108 : vector<2x32xf32>
    %112 = arith.addf %110, %111 : vector<2x32xf32>
    %113 = math.tanh %112 : vector<2x32xf32>
    %114 = arith.mulf %109, %113 : vector<2x32xf32>
    %115 = arith.truncf %114 : vector<2x32xf32> to vector<2x32xbf16>
    %cst_27 = arith.constant dense<0.000000e+00> : vector<2x128xf32>
    %116 = tpu.matmul %115, %9, %cst_27 {dimension_numbers = #tpu.dot_dimension_numbers<[1], [0], [0], [1], [0, 0, 1, 1], [], []>} : vector<2x32xbf16>, vector<32x128xbf16>, vector<2x128xf32> -> vector<2x128xf32>
    %cst_28 = arith.constant dense<0.000000e+00> : vector<2x128xf32>
    %117 = tpu.matmul %115, %11, %cst_28 {dimension_numbers = #tpu.dot_dimension_numbers<[1], [0], [0], [1], [0, 0, 1, 1], [], []>} : vector<2x32xbf16>, vector<32x128xbf16>, vector<2x128xf32> -> vector<2x128xf32>
    %118 = arith.addf %117, %97 : vector<2x128xf32>
    %119 = vector.broadcast %14 : vector<1x128xf32> to vector<2x128xf32>
    %120 = arith.addf %118, %119 : vector<2x128xf32>
    %121 = arith.negf %120 : vector<2x128xf32>
    %122 = math.exp %121 : vector<2x128xf32>
    %cst_29 = arith.constant 1.000000e+00 : f32
    %123 = vector.broadcast %cst_29 : f32 to vector<2x128xf32>
    %124 = arith.addf %123, %122 : vector<2x128xf32>
    %125 = arith.divf %123, %124 : vector<2x128xf32>
    %126 = math.tanh %120 : vector<2x128xf32>
    %127 = vector.extract_strided_slice %125 {offsets = [0, 0], sizes = [2, 32], strides = [1, 1]} : vector<2x128xf32> to vector<2x32xf32>
    %128 = vector.extract_strided_slice %125 {offsets = [0, 32], sizes = [2, 32], strides = [1, 1]} : vector<2x128xf32> to vector<2x32xf32>
    %129 = vector.extract_strided_slice %126 {offsets = [0, 64], sizes = [2, 32], strides = [1, 1]} : vector<2x128xf32> to vector<2x32xf32>
    %130 = vector.extract_strided_slice %125 {offsets = [0, 96], sizes = [2, 32], strides = [1, 1]} : vector<2x128xf32> to vector<2x32xf32>
    %131 = arith.mulf %128, %93 : vector<2x32xf32>
    %132 = arith.mulf %127, %129 : vector<2x32xf32>
    %133 = arith.addf %131, %132 : vector<2x32xf32>
    %134 = math.tanh %133 : vector<2x32xf32>
    %135 = arith.mulf %130, %134 : vector<2x32xf32>
    %136 = arith.truncf %135 : vector<2x32xf32> to vector<2x32xbf16>
    %cst_30 = arith.constant dense<0.000000e+00> : vector<2x128xf32>
    %137 = tpu.matmul %136, %13, %cst_30 {dimension_numbers = #tpu.dot_dimension_numbers<[1], [0], [0], [1], [0, 0, 1, 1], [], []>} : vector<2x32xbf16>, vector<32x128xbf16>, vector<2x128xf32> -> vector<2x128xf32>
    %138 = vector.extract_strided_slice %7 {offsets = [6, 0], sizes = [2, 128], strides = [1, 1]} : vector<16x128xf32> to vector<2x128xf32>
    %139 = arith.addf %138, %116 : vector<2x128xf32>
    %140 = arith.negf %139 : vector<2x128xf32>
    %141 = math.exp %140 : vector<2x128xf32>
    %cst_31 = arith.constant 1.000000e+00 : f32
    %142 = vector.broadcast %cst_31 : f32 to vector<2x128xf32>
    %143 = arith.addf %142, %141 : vector<2x128xf32>
    %144 = arith.divf %142, %143 : vector<2x128xf32>
    %145 = math.tanh %139 : vector<2x128xf32>
    %146 = vector.extract_strided_slice %144 {offsets = [0, 0], sizes = [2, 32], strides = [1, 1]} : vector<2x128xf32> to vector<2x32xf32>
    %147 = vector.extract_strided_slice %144 {offsets = [0, 32], sizes = [2, 32], strides = [1, 1]} : vector<2x128xf32> to vector<2x32xf32>
    %148 = vector.extract_strided_slice %145 {offsets = [0, 64], sizes = [2, 32], strides = [1, 1]} : vector<2x128xf32> to vector<2x32xf32>
    %149 = vector.extract_strided_slice %144 {offsets = [0, 96], sizes = [2, 32], strides = [1, 1]} : vector<2x128xf32> to vector<2x32xf32>
    %150 = arith.mulf %147, %112 : vector<2x32xf32>
    %151 = arith.mulf %146, %148 : vector<2x32xf32>
    %152 = arith.addf %150, %151 : vector<2x32xf32>
    %153 = math.tanh %152 : vector<2x32xf32>
    %154 = arith.mulf %149, %153 : vector<2x32xf32>
    %155 = arith.truncf %154 : vector<2x32xf32> to vector<2x32xbf16>
    %cst_32 = arith.constant dense<0.000000e+00> : vector<2x128xf32>
    %156 = tpu.matmul %155, %9, %cst_32 {dimension_numbers = #tpu.dot_dimension_numbers<[1], [0], [0], [1], [0, 0, 1, 1], [], []>} : vector<2x32xbf16>, vector<32x128xbf16>, vector<2x128xf32> -> vector<2x128xf32>
    %cst_33 = arith.constant dense<0.000000e+00> : vector<2x128xf32>
    %157 = tpu.matmul %155, %11, %cst_33 {dimension_numbers = #tpu.dot_dimension_numbers<[1], [0], [0], [1], [0, 0, 1, 1], [], []>} : vector<2x32xbf16>, vector<32x128xbf16>, vector<2x128xf32> -> vector<2x128xf32>
    %158 = arith.addf %157, %137 : vector<2x128xf32>
    %159 = vector.broadcast %14 : vector<1x128xf32> to vector<2x128xf32>
    %160 = arith.addf %158, %159 : vector<2x128xf32>
    %161 = arith.negf %160 : vector<2x128xf32>
    %162 = math.exp %161 : vector<2x128xf32>
    %cst_34 = arith.constant 1.000000e+00 : f32
    %163 = vector.broadcast %cst_34 : f32 to vector<2x128xf32>
    %164 = arith.addf %163, %162 : vector<2x128xf32>
    %165 = arith.divf %163, %164 : vector<2x128xf32>
    %166 = math.tanh %160 : vector<2x128xf32>
    %167 = vector.extract_strided_slice %165 {offsets = [0, 0], sizes = [2, 32], strides = [1, 1]} : vector<2x128xf32> to vector<2x32xf32>
    %168 = vector.extract_strided_slice %165 {offsets = [0, 32], sizes = [2, 32], strides = [1, 1]} : vector<2x128xf32> to vector<2x32xf32>
    %169 = vector.extract_strided_slice %166 {offsets = [0, 64], sizes = [2, 32], strides = [1, 1]} : vector<2x128xf32> to vector<2x32xf32>
    %170 = vector.extract_strided_slice %165 {offsets = [0, 96], sizes = [2, 32], strides = [1, 1]} : vector<2x128xf32> to vector<2x32xf32>
    %171 = arith.mulf %168, %133 : vector<2x32xf32>
    %172 = arith.mulf %167, %169 : vector<2x32xf32>
    %173 = arith.addf %171, %172 : vector<2x32xf32>
    %174 = math.tanh %173 : vector<2x32xf32>
    %175 = arith.mulf %170, %174 : vector<2x32xf32>
    %176 = arith.truncf %175 : vector<2x32xf32> to vector<2x32xbf16>
    %cst_35 = arith.constant dense<0.000000e+00> : vector<2x128xf32>
    %177 = tpu.matmul %176, %13, %cst_35 {dimension_numbers = #tpu.dot_dimension_numbers<[1], [0], [0], [1], [0, 0, 1, 1], [], []>} : vector<2x32xbf16>, vector<32x128xbf16>, vector<2x128xf32> -> vector<2x128xf32>
    %178 = vector.extract_strided_slice %7 {offsets = [8, 0], sizes = [2, 128], strides = [1, 1]} : vector<16x128xf32> to vector<2x128xf32>
    %179 = arith.addf %178, %156 : vector<2x128xf32>
    %180 = arith.negf %179 : vector<2x128xf32>
    %181 = math.exp %180 : vector<2x128xf32>
    %cst_36 = arith.constant 1.000000e+00 : f32
    %182 = vector.broadcast %cst_36 : f32 to vector<2x128xf32>
    %183 = arith.addf %182, %181 : vector<2x128xf32>
    %184 = arith.divf %182, %183 : vector<2x128xf32>
    %185 = math.tanh %179 : vector<2x128xf32>
    %186 = vector.extract_strided_slice %184 {offsets = [0, 0], sizes = [2, 32], strides = [1, 1]} : vector<2x128xf32> to vector<2x32xf32>
    %187 = vector.extract_strided_slice %184 {offsets = [0, 32], sizes = [2, 32], strides = [1, 1]} : vector<2x128xf32> to vector<2x32xf32>
    %188 = vector.extract_strided_slice %185 {offsets = [0, 64], sizes = [2, 32], strides = [1, 1]} : vector<2x128xf32> to vector<2x32xf32>
    %189 = vector.extract_strided_slice %184 {offsets = [0, 96], sizes = [2, 32], strides = [1, 1]} : vector<2x128xf32> to vector<2x32xf32>
    %190 = arith.mulf %187, %152 : vector<2x32xf32>
    %191 = arith.mulf %186, %188 : vector<2x32xf32>
    %192 = arith.addf %190, %191 : vector<2x32xf32>
    %193 = math.tanh %192 : vector<2x32xf32>
    %194 = arith.mulf %189, %193 : vector<2x32xf32>
    %195 = arith.truncf %194 : vector<2x32xf32> to vector<2x32xbf16>
    %cst_37 = arith.constant dense<0.000000e+00> : vector<2x128xf32>
    %196 = tpu.matmul %195, %9, %cst_37 {dimension_numbers = #tpu.dot_dimension_numbers<[1], [0], [0], [1], [0, 0, 1, 1], [], []>} : vector<2x32xbf16>, vector<32x128xbf16>, vector<2x128xf32> -> vector<2x128xf32>
    %cst_38 = arith.constant dense<0.000000e+00> : vector<2x128xf32>
    %197 = tpu.matmul %195, %11, %cst_38 {dimension_numbers = #tpu.dot_dimension_numbers<[1], [0], [0], [1], [0, 0, 1, 1], [], []>} : vector<2x32xbf16>, vector<32x128xbf16>, vector<2x128xf32> -> vector<2x128xf32>
    %198 = arith.addf %197, %177 : vector<2x128xf32>
    %199 = vector.broadcast %14 : vector<1x128xf32> to vector<2x128xf32>
    %200 = arith.addf %198, %199 : vector<2x128xf32>
    %201 = arith.negf %200 : vector<2x128xf32>
    %202 = math.exp %201 : vector<2x128xf32>
    %cst_39 = arith.constant 1.000000e+00 : f32
    %203 = vector.broadcast %cst_39 : f32 to vector<2x128xf32>
    %204 = arith.addf %203, %202 : vector<2x128xf32>
    %205 = arith.divf %203, %204 : vector<2x128xf32>
    %206 = math.tanh %200 : vector<2x128xf32>
    %207 = vector.extract_strided_slice %205 {offsets = [0, 0], sizes = [2, 32], strides = [1, 1]} : vector<2x128xf32> to vector<2x32xf32>
    %208 = vector.extract_strided_slice %205 {offsets = [0, 32], sizes = [2, 32], strides = [1, 1]} : vector<2x128xf32> to vector<2x32xf32>
    %209 = vector.extract_strided_slice %206 {offsets = [0, 64], sizes = [2, 32], strides = [1, 1]} : vector<2x128xf32> to vector<2x32xf32>
    %210 = vector.extract_strided_slice %205 {offsets = [0, 96], sizes = [2, 32], strides = [1, 1]} : vector<2x128xf32> to vector<2x32xf32>
    %211 = arith.mulf %208, %173 : vector<2x32xf32>
    %212 = arith.mulf %207, %209 : vector<2x32xf32>
    %213 = arith.addf %211, %212 : vector<2x32xf32>
    %214 = math.tanh %213 : vector<2x32xf32>
    %215 = arith.mulf %210, %214 : vector<2x32xf32>
    %216 = arith.truncf %215 : vector<2x32xf32> to vector<2x32xbf16>
    %cst_40 = arith.constant dense<0.000000e+00> : vector<2x128xf32>
    %217 = tpu.matmul %216, %13, %cst_40 {dimension_numbers = #tpu.dot_dimension_numbers<[1], [0], [0], [1], [0, 0, 1, 1], [], []>} : vector<2x32xbf16>, vector<32x128xbf16>, vector<2x128xf32> -> vector<2x128xf32>
    %218 = vector.extract_strided_slice %7 {offsets = [10, 0], sizes = [2, 128], strides = [1, 1]} : vector<16x128xf32> to vector<2x128xf32>
    %219 = arith.addf %218, %196 : vector<2x128xf32>
    %220 = arith.negf %219 : vector<2x128xf32>
    %221 = math.exp %220 : vector<2x128xf32>
    %cst_41 = arith.constant 1.000000e+00 : f32
    %222 = vector.broadcast %cst_41 : f32 to vector<2x128xf32>
    %223 = arith.addf %222, %221 : vector<2x128xf32>
    %224 = arith.divf %222, %223 : vector<2x128xf32>
    %225 = math.tanh %219 : vector<2x128xf32>
    %226 = vector.extract_strided_slice %224 {offsets = [0, 0], sizes = [2, 32], strides = [1, 1]} : vector<2x128xf32> to vector<2x32xf32>
    %227 = vector.extract_strided_slice %224 {offsets = [0, 32], sizes = [2, 32], strides = [1, 1]} : vector<2x128xf32> to vector<2x32xf32>
    %228 = vector.extract_strided_slice %225 {offsets = [0, 64], sizes = [2, 32], strides = [1, 1]} : vector<2x128xf32> to vector<2x32xf32>
    %229 = vector.extract_strided_slice %224 {offsets = [0, 96], sizes = [2, 32], strides = [1, 1]} : vector<2x128xf32> to vector<2x32xf32>
    %230 = arith.mulf %227, %192 : vector<2x32xf32>
    %231 = arith.mulf %226, %228 : vector<2x32xf32>
    %232 = arith.addf %230, %231 : vector<2x32xf32>
    %233 = math.tanh %232 : vector<2x32xf32>
    %234 = arith.mulf %229, %233 : vector<2x32xf32>
    %235 = arith.truncf %234 : vector<2x32xf32> to vector<2x32xbf16>
    %cst_42 = arith.constant dense<0.000000e+00> : vector<2x128xf32>
    %236 = tpu.matmul %235, %9, %cst_42 {dimension_numbers = #tpu.dot_dimension_numbers<[1], [0], [0], [1], [0, 0, 1, 1], [], []>} : vector<2x32xbf16>, vector<32x128xbf16>, vector<2x128xf32> -> vector<2x128xf32>
    %cst_43 = arith.constant dense<0.000000e+00> : vector<2x128xf32>
    %237 = tpu.matmul %235, %11, %cst_43 {dimension_numbers = #tpu.dot_dimension_numbers<[1], [0], [0], [1], [0, 0, 1, 1], [], []>} : vector<2x32xbf16>, vector<32x128xbf16>, vector<2x128xf32> -> vector<2x128xf32>
    %238 = arith.addf %237, %217 : vector<2x128xf32>
    %239 = vector.broadcast %14 : vector<1x128xf32> to vector<2x128xf32>
    %240 = arith.addf %238, %239 : vector<2x128xf32>
    %241 = arith.negf %240 : vector<2x128xf32>
    %242 = math.exp %241 : vector<2x128xf32>
    %cst_44 = arith.constant 1.000000e+00 : f32
    %243 = vector.broadcast %cst_44 : f32 to vector<2x128xf32>
    %244 = arith.addf %243, %242 : vector<2x128xf32>
    %245 = arith.divf %243, %244 : vector<2x128xf32>
    %246 = math.tanh %240 : vector<2x128xf32>
    %247 = vector.extract_strided_slice %245 {offsets = [0, 0], sizes = [2, 32], strides = [1, 1]} : vector<2x128xf32> to vector<2x32xf32>
    %248 = vector.extract_strided_slice %245 {offsets = [0, 32], sizes = [2, 32], strides = [1, 1]} : vector<2x128xf32> to vector<2x32xf32>
    %249 = vector.extract_strided_slice %246 {offsets = [0, 64], sizes = [2, 32], strides = [1, 1]} : vector<2x128xf32> to vector<2x32xf32>
    %250 = vector.extract_strided_slice %245 {offsets = [0, 96], sizes = [2, 32], strides = [1, 1]} : vector<2x128xf32> to vector<2x32xf32>
    %251 = arith.mulf %248, %213 : vector<2x32xf32>
    %252 = arith.mulf %247, %249 : vector<2x32xf32>
    %253 = arith.addf %251, %252 : vector<2x32xf32>
    %254 = math.tanh %253 : vector<2x32xf32>
    %255 = arith.mulf %250, %254 : vector<2x32xf32>
    %256 = arith.truncf %255 : vector<2x32xf32> to vector<2x32xbf16>
    %cst_45 = arith.constant dense<0.000000e+00> : vector<2x128xf32>
    %257 = tpu.matmul %256, %13, %cst_45 {dimension_numbers = #tpu.dot_dimension_numbers<[1], [0], [0], [1], [0, 0, 1, 1], [], []>} : vector<2x32xbf16>, vector<32x128xbf16>, vector<2x128xf32> -> vector<2x128xf32>
    %258 = vector.extract_strided_slice %7 {offsets = [12, 0], sizes = [2, 128], strides = [1, 1]} : vector<16x128xf32> to vector<2x128xf32>
    %259 = arith.addf %258, %236 : vector<2x128xf32>
    %260 = arith.negf %259 : vector<2x128xf32>
    %261 = math.exp %260 : vector<2x128xf32>
    %cst_46 = arith.constant 1.000000e+00 : f32
    %262 = vector.broadcast %cst_46 : f32 to vector<2x128xf32>
    %263 = arith.addf %262, %261 : vector<2x128xf32>
    %264 = arith.divf %262, %263 : vector<2x128xf32>
    %265 = math.tanh %259 : vector<2x128xf32>
    %266 = vector.extract_strided_slice %264 {offsets = [0, 0], sizes = [2, 32], strides = [1, 1]} : vector<2x128xf32> to vector<2x32xf32>
    %267 = vector.extract_strided_slice %264 {offsets = [0, 32], sizes = [2, 32], strides = [1, 1]} : vector<2x128xf32> to vector<2x32xf32>
    %268 = vector.extract_strided_slice %265 {offsets = [0, 64], sizes = [2, 32], strides = [1, 1]} : vector<2x128xf32> to vector<2x32xf32>
    %269 = vector.extract_strided_slice %264 {offsets = [0, 96], sizes = [2, 32], strides = [1, 1]} : vector<2x128xf32> to vector<2x32xf32>
    %270 = arith.mulf %267, %232 : vector<2x32xf32>
    %271 = arith.mulf %266, %268 : vector<2x32xf32>
    %272 = arith.addf %270, %271 : vector<2x32xf32>
    %273 = math.tanh %272 : vector<2x32xf32>
    %274 = arith.mulf %269, %273 : vector<2x32xf32>
    %275 = arith.truncf %274 : vector<2x32xf32> to vector<2x32xbf16>
    %cst_47 = arith.constant dense<0.000000e+00> : vector<2x128xf32>
    %276 = tpu.matmul %275, %9, %cst_47 {dimension_numbers = #tpu.dot_dimension_numbers<[1], [0], [0], [1], [0, 0, 1, 1], [], []>} : vector<2x32xbf16>, vector<32x128xbf16>, vector<2x128xf32> -> vector<2x128xf32>
    %cst_48 = arith.constant dense<0.000000e+00> : vector<2x128xf32>
    %277 = tpu.matmul %275, %11, %cst_48 {dimension_numbers = #tpu.dot_dimension_numbers<[1], [0], [0], [1], [0, 0, 1, 1], [], []>} : vector<2x32xbf16>, vector<32x128xbf16>, vector<2x128xf32> -> vector<2x128xf32>
    %278 = arith.addf %277, %257 : vector<2x128xf32>
    %279 = vector.broadcast %14 : vector<1x128xf32> to vector<2x128xf32>
    %280 = arith.addf %278, %279 : vector<2x128xf32>
    %281 = arith.negf %280 : vector<2x128xf32>
    %282 = math.exp %281 : vector<2x128xf32>
    %cst_49 = arith.constant 1.000000e+00 : f32
    %283 = vector.broadcast %cst_49 : f32 to vector<2x128xf32>
    %284 = arith.addf %283, %282 : vector<2x128xf32>
    %285 = arith.divf %283, %284 : vector<2x128xf32>
    %286 = math.tanh %280 : vector<2x128xf32>
    %287 = vector.extract_strided_slice %285 {offsets = [0, 0], sizes = [2, 32], strides = [1, 1]} : vector<2x128xf32> to vector<2x32xf32>
    %288 = vector.extract_strided_slice %285 {offsets = [0, 32], sizes = [2, 32], strides = [1, 1]} : vector<2x128xf32> to vector<2x32xf32>
    %289 = vector.extract_strided_slice %286 {offsets = [0, 64], sizes = [2, 32], strides = [1, 1]} : vector<2x128xf32> to vector<2x32xf32>
    %290 = vector.extract_strided_slice %285 {offsets = [0, 96], sizes = [2, 32], strides = [1, 1]} : vector<2x128xf32> to vector<2x32xf32>
    %291 = arith.mulf %288, %253 : vector<2x32xf32>
    %292 = arith.mulf %287, %289 : vector<2x32xf32>
    %293 = arith.addf %291, %292 : vector<2x32xf32>
    %294 = math.tanh %293 : vector<2x32xf32>
    %295 = arith.mulf %290, %294 : vector<2x32xf32>
    %296 = arith.truncf %295 : vector<2x32xf32> to vector<2x32xbf16>
    %cst_50 = arith.constant dense<0.000000e+00> : vector<2x128xf32>
    %297 = tpu.matmul %296, %13, %cst_50 {dimension_numbers = #tpu.dot_dimension_numbers<[1], [0], [0], [1], [0, 0, 1, 1], [], []>} : vector<2x32xbf16>, vector<32x128xbf16>, vector<2x128xf32> -> vector<2x128xf32>
    %298 = vector.extract_strided_slice %7 {offsets = [14, 0], sizes = [2, 128], strides = [1, 1]} : vector<16x128xf32> to vector<2x128xf32>
    %299 = arith.addf %298, %276 : vector<2x128xf32>
    %300 = arith.negf %299 : vector<2x128xf32>
    %301 = math.exp %300 : vector<2x128xf32>
    %cst_51 = arith.constant 1.000000e+00 : f32
    %302 = vector.broadcast %cst_51 : f32 to vector<2x128xf32>
    %303 = arith.addf %302, %301 : vector<2x128xf32>
    %304 = arith.divf %302, %303 : vector<2x128xf32>
    %305 = math.tanh %299 : vector<2x128xf32>
    %306 = vector.extract_strided_slice %304 {offsets = [0, 0], sizes = [2, 32], strides = [1, 1]} : vector<2x128xf32> to vector<2x32xf32>
    %307 = vector.extract_strided_slice %304 {offsets = [0, 32], sizes = [2, 32], strides = [1, 1]} : vector<2x128xf32> to vector<2x32xf32>
    %308 = vector.extract_strided_slice %305 {offsets = [0, 64], sizes = [2, 32], strides = [1, 1]} : vector<2x128xf32> to vector<2x32xf32>
    %309 = vector.extract_strided_slice %304 {offsets = [0, 96], sizes = [2, 32], strides = [1, 1]} : vector<2x128xf32> to vector<2x32xf32>
    %310 = arith.mulf %307, %272 : vector<2x32xf32>
    %311 = arith.mulf %306, %308 : vector<2x32xf32>
    %312 = arith.addf %310, %311 : vector<2x32xf32>
    %313 = math.tanh %312 : vector<2x32xf32>
    %314 = arith.mulf %309, %313 : vector<2x32xf32>
    %315 = arith.truncf %314 : vector<2x32xf32> to vector<2x32xbf16>
    %cst_52 = arith.constant dense<0.000000e+00> : vector<2x128xf32>
    %316 = tpu.matmul %315, %11, %cst_52 {dimension_numbers = #tpu.dot_dimension_numbers<[1], [0], [0], [1], [0, 0, 1, 1], [], []>} : vector<2x32xbf16>, vector<32x128xbf16>, vector<2x128xf32> -> vector<2x128xf32>
    %317 = arith.addf %316, %297 : vector<2x128xf32>
    %318 = vector.broadcast %14 : vector<1x128xf32> to vector<2x128xf32>
    %319 = arith.addf %317, %318 : vector<2x128xf32>
    %320 = arith.negf %319 : vector<2x128xf32>
    %321 = math.exp %320 : vector<2x128xf32>
    %cst_53 = arith.constant 1.000000e+00 : f32
    %322 = vector.broadcast %cst_53 : f32 to vector<2x128xf32>
    %323 = arith.addf %322, %321 : vector<2x128xf32>
    %324 = arith.divf %322, %323 : vector<2x128xf32>
    %325 = math.tanh %319 : vector<2x128xf32>
    %326 = vector.extract_strided_slice %324 {offsets = [0, 0], sizes = [2, 32], strides = [1, 1]} : vector<2x128xf32> to vector<2x32xf32>
    %327 = vector.extract_strided_slice %324 {offsets = [0, 32], sizes = [2, 32], strides = [1, 1]} : vector<2x128xf32> to vector<2x32xf32>
    %328 = vector.extract_strided_slice %325 {offsets = [0, 64], sizes = [2, 32], strides = [1, 1]} : vector<2x128xf32> to vector<2x32xf32>
    %329 = vector.extract_strided_slice %324 {offsets = [0, 96], sizes = [2, 32], strides = [1, 1]} : vector<2x128xf32> to vector<2x32xf32>
    %330 = arith.mulf %327, %293 : vector<2x32xf32>
    %331 = arith.mulf %326, %328 : vector<2x32xf32>
    %332 = arith.addf %330, %331 : vector<2x32xf32>
    %333 = math.tanh %332 : vector<2x32xf32>
    %334 = arith.mulf %329, %333 : vector<2x32xf32>
    %335 = arith.truncf %334 : vector<2x32xf32> to vector<2x32xbf16>
    %c0_54 = arith.constant 0 : index
    %c0_55 = arith.constant 0 : index
    %336 = vector.load %arg7[%c0_54, %c0_55] : memref<32x2xf32, #tpu.memory_space<vmem>>, vector<32x2xf32>
    %337 = arith.truncf %336 : vector<32x2xf32> to vector<32x2xbf16>
    %cst_56 = arith.constant dense<0.000000e+00> : vector<2x2xf32>
    %338 = tpu.matmul %335, %337, %cst_56 {dimension_numbers = #tpu.dot_dimension_numbers<[1], [0], [0], [1], [0, 0, 1, 1], [], []>} : vector<2x32xbf16>, vector<32x2xbf16>, vector<2x2xf32> -> vector<2x2xf32>
    %c0_57 = arith.constant 0 : index
    %c0_58 = arith.constant 0 : index
    %339 = vector.load %arg8[%c0_57, %c0_58] : memref<1x2xf32, #tpu.memory_space<vmem>>, vector<1x2xf32>
    %340 = vector.broadcast %339 : vector<1x2xf32> to vector<2x2xf32>
    %341 = arith.addf %338, %340 : vector<2x2xf32>
    %c0_59 = arith.constant 0 : index
    %c0_60 = arith.constant 0 : index
    %342 = vector.load %arg9[%c0_59, %c0_60] : memref<2x2xf32, #tpu.memory_space<vmem>>, vector<2x2xf32>
    tpu.vector_store %arg9[%c0_59, %c0_60], %341 {strides = array<i32>} : memref<2x2xf32, #tpu.memory_space<vmem>>, vector<2x2xf32>,
    return
  }
}

</mosaic_0001>

<bundles_post_ra>
// kernel: tpu_custom_call.1
= control target key start
LH: loop header
LB: loop body
LE: loop exit
PB: predicated region body
PF: predicated region fallthrough
CT: control target
= control target key end

     0   :  { %14 = vsyncpa [#allocation3], 0  ;;  %s2737_s0 = inlined_call_operand.hbm [shape: f32[16,16], index: 0, kind: input, shape index: {}]   ;;  %s2738_s1 = inlined_call_operand.hbm [shape: f32[16,128], index: 1, kind: input, shape index: {}]   ;;  %s2739_s2 = inlined_call_operand.vmem [shape: f32[1,128], index: 2, kind: input, shape index: {}]   ;;  %s2740_s3 = inlined_call_operand.vmem [shape: f32[32,128], index: 3, kind: input, shape index: {}]   ;;  %s2741_s4 = inlined_call_operand.hbm [shape: f32[32,128], index: 4, kind: input, shape index: {}]   ;;  %s2742_s5 = inlined_call_operand.hbm [shape: f32[32,128], index: 5, kind: input, shape index: {}]   ;;  %s2743_s6 = inlined_call_operand.vmem [shape: f32[1,128], index: 6, kind: input, shape index: {}]   ;;  %s2744_s7 = inlined_call_operand.vmem [shape: f32[32,2], index: 7, kind: input, shape index: {}]   ;;  %s2745_s8 = inlined_call_operand.vmem [shape: f32[1,2], index: 8, kind: input, shape index: {}]   ;;  %s2746_s9 = inlined_call_operand.hbm [shape: f32[2,2], index: 9, kind: output, shape index: {}]  }
   0x1   :  { %15 = vsyncpa [#allocation6], 0 }
   0x2   :  { %16 = vsyncpa [#allocation9], 0 }
   0x3   :  { %17 = vsyncpa [#allocation4], 0  ;;  %s2243_s30 = smov [#allocation5]   ;;  %s2244_s11 = smov [#allocation2]  }
   0x4   :  { %s35_s10 = sshll.u32 %s2243_s30, 4  ;;  %s23_s12 = sshll.u32 %s2244_s11, 4  ;;  %s36_s10 = int_to_ptr.vmem [resolvable:$true] %s35_s10  ;;  %s2304_s12 = int_to_ptr.vmem [resolvable:$true] %s23_s12 }
   0x5   :  { %s2125_s15 = scalar_lea.hbm %s2738_s1, 256 }
   0x6   :  { %p2126_p0 = scmp.ne.s32.totalorder %s2738_s1, %s2125_s15  ;;  %p2129_p1 = scmp.lt.u32.totalorder %s2125_s15, %s2738_s1 }
   0x8   :  { %p2131_p2 = pnand %p2129_p1, %p2126_p0 }
   0xa   :  { %2134 = shalt.err (!%p2131_p2)
}
   0xb   :  { %s2135_s20 = scalar_lea.vmem %s36_s10, 256  ;;  %p2140_p4 = scmp.lt.s32.totalorder %s36_s10, %s36_s10 }
   0xc   :  { %p2136_p3 = scmp.ne.s32.totalorder %s36_s10, %s2135_s20  ;;  %p2141_p5 = scmp.lt.s32.totalorder %s2135_s20, %s2135_s20 }
   0xe   :  { %p2142_p6 = por %p2141_p5, %p2140_p4 }
  0x10   :  { %p2143_p7 = pnand %p2142_p6, %p2136_p3 }
  0x12   :  { %2146 = shalt.err (!%p2143_p7)
}
  0x13   :  { %s2245_s21 = smov 128   ;;  %s2246_s22 = smov 8  }
  0x14   :  { %41 = dma.hbm_to_vmem [thread:$0]  %s2738_s1, 256, %s36_s10, [#allocation6], %s2245_s21, %s2245_s21, %s2246_s22  }
  0x15   :  { %s2147_s27 = scalar_lea.hbm %s2737_s0, 256 }
  0x16   :  { %p2148_p8 = scmp.ne.s32.totalorder %s2737_s0, %s2147_s27  ;;  %p2151_p9 = scmp.lt.u32.totalorder %s2147_s27, %s2737_s0 }
  0x18   :  { %p2153_p10 = pnand %p2151_p9, %p2148_p8 }
  0x1a   :  { %2156 = shalt.err (!%p2153_p10)
}
  0x1b   :  { %s2157_s13 = scalar_lea.vmem %s2304_s12, 256  ;;  %p2162_p12 = scmp.lt.s32.totalorder %s2304_s12, %s2304_s12 }
  0x1c   :  { %p2158_p11 = scmp.ne.s32.totalorder %s2304_s12, %s2157_s13  ;;  %p2163_p13 = scmp.lt.s32.totalorder %s2157_s13, %s2157_s13 }
  0x1e   :  { %p2164_p0 = por %p2163_p13, %p2162_p12 }
  0x20   :  { %p2165_p1 = pnand %p2164_p0, %p2158_p11 }
  0x22   :  { %2168 = shalt.err (!%p2165_p1)
}
  0x23   :  { %29 = dma.hbm_to_vmem [thread:$0]  %s2737_s0, 256, %s2304_s12, [#allocation3], %s2245_s21, %s2245_s21, %s2246_s22  }
  0x24   :  { %s2247_s14 = smov [#allocation7]   ;;  %s2248_s16 = smov [#allocation8]  }
  0x25   :  { %s51_s15 = sshll.u32 %s2247_s14, 4  ;;  %s63_s17 = sshll.u32 %s2248_s16, 4  ;;  %s52_s15 = int_to_ptr.vmem [resolvable:$true] %s51_s15  ;;  %s2341_s17 = int_to_ptr.vmem [resolvable:$true] %s63_s17 }
  0x26   :  { %s2169_s20 = scalar_lea.hbm %s2741_s4, 512 }
  0x27   :  { %p2170_p2 = scmp.ne.s32.totalorder %s2741_s4, %s2169_s20  ;;  %p2173_p3 = scmp.lt.u32.totalorder %s2169_s20, %s2741_s4 }
  0x29   :  { %p2175_p4 = pnand %p2173_p3, %p2170_p2 }
  0x2b   :  { %2178 = shalt.err (!%p2175_p4)
}
  0x2c   :  { %s2179_s0 = scalar_lea.vmem %s52_s15, 512  ;;  %p2184_p6 = scmp.lt.s32.totalorder %s52_s15, %s52_s15 }
  0x2d   :  { %p2180_p5 = scmp.ne.s32.totalorder %s52_s15, %s2179_s0  ;;  %p2185_p7 = scmp.lt.s32.totalorder %s2179_s0, %s2179_s0 }
  0x2f   :  { %p2186_p8 = por %p2185_p7, %p2184_p6 }
  0x31   :  { %p2187_p9 = pnand %p2186_p8, %p2180_p5 }
  0x33   :  { %2190 = shalt.err (!%p2187_p9)
}
  0x34   :  { %57 = dma.hbm_to_vmem [thread:$0]  %s2741_s4, 512, %s52_s15, [#allocation6], %s2245_s21, %s2245_s21, %s2246_s22  }
  0x35   :  { %s2191_s30 = scalar_lea.hbm %s2742_s5, 512 }
  0x36   :  { %p2192_p10 = scmp.ne.s32.totalorder %s2742_s5, %s2191_s30  ;;  %p2195_p11 = scmp.lt.u32.totalorder %s2191_s30, %s2742_s5 }
  0x38   :  { %p2197_p12 = pnand %p2195_p11, %p2192_p10 }
  0x3a   :  { %2200 = shalt.err (!%p2197_p12)
}
  0x3b   :  { %s2201_s14 = scalar_lea.vmem %s2341_s17, 512  ;;  %p2206_p0 = scmp.lt.s32.totalorder %s2341_s17, %s2341_s17 }
  0x3c   :  { %p2202_p13 = scmp.ne.s32.totalorder %s2341_s17, %s2201_s14  ;;  %p2207_p1 = scmp.lt.s32.totalorder %s2201_s14, %s2201_s14 }
  0x3e   :  { %p2208_p2 = por %p2207_p1, %p2206_p0 }
  0x40   :  { %p2209_p3 = pnand %p2208_p2, %p2202_p13 }
  0x42   :  { %2212 = shalt.err (!%p2209_p3)
}
  0x43   :  { %69 = dma.hbm_to_vmem [thread:$0]  %s2742_s5, 512, %s2341_s17, [#allocation9], %s2245_s21, %s2245_s21, %s2246_s22  }
  0x44   :  { %2235 = dma.done.wait [#allocation3], 256  }
  0x45   :  { %2236 = vsyncadd [#allocation3], 4294967040 }
  0x46   :  { %2237 = dma.done.wait [#allocation6], 768  }
  0x47   :  { %2238 = vsyncadd [#allocation6], 4294966528 }
  0x48   :  { %2239 = dma.done.wait [#allocation9], 512  }
  0x49   :  { %2240 = vsyncadd [#allocation9], 4294966784  ;;  %v2249_v0 = vmov 0.0   ;;  %vm2250_vm0 = vmmov 0   ;;  %v92_v1 = vld [vmem:[#allocation5] sm:$0xff]  ;;  %v93_v2 = vld [vmem:[#allocation5 + $0x8] sm:$0xff] }
  0x4a   :  { %1795 = vmatprep.subr.bf16.mxu0 %v2249_v0  ;;  %1797 = vmatprep.mubr.msk.bf16.mxu0 %vm2250_vm0, %v2249_v0  ;;  %v89_v3 = vld [vmem:[#allocation2] sm:$0xff]  ;;  %v94_v4 = vpack.c.bf16 %v93_v2, %v92_v1  ;;  %v90_v5 = vld [vmem:[#allocation2 + $0x8] sm:$0xff]  ;;  %vm102_vm1 = vcmask 130048   ;;  %s2251_s22 = smov 64   ;;  %v155_v29 = vld [vmem:[#allocation7 + $0x10] sm:$0xff]  ;;  %vm195_vm2 = vcmask 261120  }
  0x4b   :  { %1801 = vmatprep.subr.bf16.mxu1 %v2249_v0  ;;  %1805 = vmatprep.mubr.msk.bf16.mxu1 %vm2250_vm0, %v2249_v0  ;;  %v91_v6 = vpack.c.bf16 %v90_v5, %v89_v3  ;;  %v1681_v7 = vld [vmem:[%s2739_s2] ss:$0 sm:$0xff]  ;;  %s2252_s2 = smov 32   ;;  %v154_v25 = vld [vmem:[#allocation7 + $0x8] sm:$0xff]  ;;  %v156_v30 = vld [vmem:[#allocation7 + $0x18] sm:$0xff]  ;;  %vm1662_vm3 = vcmask 9216  }
  0x4c   :  { %1796 = vmatpush3.bf16.msra.mxu0 %v94_v4  ;;  %v153_v24 = vld [vmem:[#allocation7] sm:$0xff]  ;;  %v148_v28 = vld [vmem:[%s2740_s3 + $0x8] sm:$0xff]  ;;  %v149_v32 = vld [vmem:[%s2740_s3 + $0x10] sm:$0xff]  ;;  %v2418_v34 = vpack.c.bf16 %v156_v30, %v155_v29 }
  0x4d   :  { %1809 = vmatprep.subr.bf16.mxu0 %v2249_v0  ;;  %v147_v26 = vld [vmem:[%s2740_s3] sm:$0xff]  ;;  %v2404_v27 = vpack.c.bf16 %v154_v25, %v153_v24  ;;  %v150_v33 = vld [vmem:[%s2740_s3 + $0x18] sm:$0xff] }
  0x4e   :  { %v2409_v31 = vpack.c.bf16 %v148_v28, %v147_v26  ;;  %v2422_v35 = vpack.c.bf16 %v150_v33, %v149_v32  ;;  %v2444_v41 = vld [vmem:[%s2743_s6] ss:$0 sm:$0xff] }
  0x4f   :  { %1798 = vmatmul.mubr.msk.bf16.vlgmr.msra.gmra.mrb[0].mxu0 %vm102_vm1, %v91_v6 }
  0x50   :  { %1813 = vmatprep.mubr.msk.bf16.mxu0 %vm2250_vm0, %v2249_v0  ;;  %1810 = vmatpush3.bf16.msra.mxu0 %v2404_v27 }
  0x51   :  { %1802 = vmatpush3.bf16.msra.mxu1 %v2409_v31  ;;  %1811 = vmatprep.subr.bf16.mxu0 %v2249_v0 }
  0x52   :  { %1803 = vmatprep.subr.bf16.mxu1 %v2249_v0 }
  0x54   :  { %1812 = vmatpush3.bf16.msra.mxu0 %v2418_v34 }
  0x55   :  { %1804 = vmatpush3.bf16.msra.mxu1 %v2422_v35  ;;  %1825 = vmatprep.subr.bf16.mxu0 %v2249_v0 }
  0x56   :  { %1817 = vmatprep.subr.bf16.mxu1 %v2249_v0 }
 0x122   :  { %v140_v8 = vpop.f32.mrb[0].mxu0 }
 0x123   :  { %v2390_v9 = vadd.f32 %v1681_v7, %v140_v8  ;;  %v1799_v10 = vpop.f32.mrb[1].mxu0 }
 0x124   :  { %v143_v11 = vpop.f32.mrb[2].mxu0 }
 0x125   :  { %v2392_v12 = vadd.f32 %v1681_v7, %v143_v11  ;;  %v1800_v13 = vpop.f32.mrb[3].mxu0  ;;  %1996 = vtanh.f32 %v2390_v9  ;;  %v1683_v15 = vmul.f32 -1.442695, %v2390_v9 }
 0x126   :  { %v159_v13 = vld [vmem:[#allocation8] sm:$0xff] }
 0x127   :  { %1998 = vpow2.f32 %v1683_v15  ;;  %v161_v15 = vld [vmem:[#allocation8 + $0x10] sm:$0xff] }
 0x12f   :  { %v1997_v14 = vpop.eup %1996 }
 0x130   :  { %176 = vrot.lane.b32.xlu0 %v1997_v14, %s2251_s22  ;;  %v160_v14 = vld [vmem:[#allocation8 + $0x8] sm:$0xff] }
 0x131   :  { %v1999_v16 = vpop.eup %1998 }
 0x132   :  { %v170_v17 = vadd.f32 1.0, %v1999_v16  ;;  %v2459_v16 = vpack.c.bf16 %v160_v14, %v159_v13 }
 0x134   :  { %2000 = vrcp.f32 %v170_v17  ;;  %v162_v17 = vld [vmem:[#allocation8 + $0x18] sm:$0xff] }
 0x13e   :  { %v2001_v18 = vpop.eup %2000 }
 0x13f   :  { %v174_v21 = vmul.f32 0.0, %v2001_v18 }
 0x1a2   :  { %v177_v19 = vpop.permute.xlu0 %176 }
 0x1a3   :  { %v179_v20 = vmul.f32 %v2001_v18, %v177_v19 }
 0x1a5   :  { %181 = vrot.lane.b32.xlu0 %v179_v20, %s2252_s2 }
 0x217   :  { %v182_v22 = vpop.permute.xlu0 %181 }
 0x218   :  { %v2398_v23 = vadd.f32 %v182_v22, %v174_v21 }
 0x21a   :  { %2002 = vtanh.f32 %v2398_v23  ;;  %v368_v4 = vrot.slane %v2398_v23, 6 }
 0x224   :  { %v2003_v36 = vpop.eup %2002 }
 0x225   :  { %187 = vrot.lane.b32.xlu1 %v2003_v36, %s2251_s22 }
 0x297   :  { %v188_v37 = vpop.permute.xlu1 %187 }
 0x298   :  { %v190_v38 = vmul.f32 %v2001_v18, %v188_v37  ;;  %v2462_v18 = vpack.c.bf16 %v162_v17, %v161_v15 }
 0x29a   :  { %v191_v39 = vpack.c.bf16 %v190_v38, %v190_v38 }
 0x29c   :  { %193 = vrot.lane.b32.xlu1 %v191_v39, %s2252_s2 }
 0x30e   :  { %v194_v40 = vpop.permute.xlu1 %193 }
 0x30f   :  { %1806 = vmatmul.mubr.msk.bf16.vlgmr.msra.gmra.mrb[0].mxu1 %vm195_vm2, %v194_v40  ;;  %1814 = vmatmul.mubr.msk.bf16.vlgmr.msra.gmra.mrb[4].mxu0 %vm195_vm2, %v194_v40 }
 0x310   :  { %1826 = vmatpush3.bf16.msra.mxu0 %v2409_v31  ;;  %1821 = vmatprep.mubr.msk.bf16.mxu1 %vm2250_vm0, %v2249_v0 }
 0x311   :  { %1827 = vmatprep.subr.bf16.mxu0 %v2249_v0  ;;  %1829 = vmatprep.mubr.msk.bf16.mxu0 %vm2250_vm0, %v2249_v0 }
 0x312   :  { %1818 = vmatpush3.bf16.msra.mxu1 %v2459_v16 }
 0x313   :  { %1819 = vmatprep.subr.bf16.mxu1 %v2249_v0 }
 0x314   :  { %1828 = vmatpush3.bf16.msra.mxu0 %v2422_v35 }
 0x315   :  { %1841 = vmatprep.subr.bf16.mxu0 %v2249_v0 }
 0x316   :  { %1820 = vmatpush3.bf16.msra.mxu1 %v2462_v18 }
 0x317   :  { %1833 = vmatprep.subr.bf16.mxu1 %v2249_v0 }
 0x3e2   :  { %v233_v42 = vpop.f32.mrb[0].mxu1  ;;  %v279_v43 = vpop.f32.mrb[4].mxu0 }
 0x3e3   :  { %v357_v44 = vrot.slane %v233_v42, 6  ;;  %v280_v45 = vadd.f32 %v2444_v41, %v279_v43  ;;  %v1807_v46 = vpop.f32.mrb[1].mxu1  ;;  %v1815_v47 = vpop.f32.mrb[5].mxu0 }
 0x3e4   :  { %v236_v48 = vpop.f32.mrb[2].mxu1  ;;  %v282_v49 = vpop.f32.mrb[6].mxu0 }
 0x3e5   :  { %v359_v50 = vadd.f32 %v357_v44, %v2390_v9  ;;  %2004 = vtanh.f32 %v280_v45  ;;  %v1808_v51 = vpop.f32.mrb[3].mxu1  ;;  %v1816_v52 = vpop.f32.mrb[7].mxu0  ;;  %v1687_v55 = vmul.f32 -1.442695, %v280_v45 }
 0x3e7   :  { %2006 = vtanh.f32 %v359_v50  ;;  %v1689_v56 = vmul.f32 -1.442695, %v359_v50 }
 0x3e8   :  { %2008 = vpow2.f32 %v1687_v55 }
 0x3e9   :  { %2010 = vpow2.f32 %v1689_v56 }
 0x3ef   :  { %v2005_v53 = vpop.eup %2004 }
 0x3f0   :  { %294 = vrot.lane.b32.xlu0 %v2005_v53, %s2251_s22 }
 0x3f1   :  { %v2007_v54 = vpop.eup %2006 }
 0x3f2   :  { %372 = vrot.lane.b32.xlu1 %v2007_v54, %s2251_s22  ;;  %v2009_v57 = vpop.eup %2008 }
 0x3f3   :  { %v2011_v58 = vpop.eup %2010  ;;  %v288_v59 = vadd.f32 1.0, %v2009_v57 }
 0x3f4   :  { %v363_v60 = vadd.f32 1.0, %v2011_v58 }
 0x3f5   :  { %2012 = vrcp.f32 %v288_v59 }
 0x3f6   :  { %2014 = vrcp.f32 %v363_v60 }
 0x3ff   :  { %v2013_v61 = vpop.eup %2012 }
 0x400   :  { %v2015_v1 = vpop.eup %2014  ;;  %v292_v5 = vmul.f32 0.0, %v2013_v61 }
 0x401   :  { %v370_v8 = vmul.f32 %v2015_v1, %v368_v4 }
 0x462   :  { %v295_v62 = vpop.permute.xlu0 %294 }
 0x463   :  { %v297_v63 = vmul.f32 %v2013_v61, %v295_v62 }
 0x464   :  { %v373_v2 = vpop.permute.xlu1 %372 }
 0x465   :  { %v375_v3 = vmul.f32 %v2015_v1, %v373_v2  ;;  %299 = vrot.lane.b32.xlu0 %v297_v63, %s2252_s2 }
 0x467   :  { %377 = vrot.lane.b32.xlu1 %v375_v3, %s2252_s2 }
 0x4d7   :  { %v300_v6 = vpop.permute.xlu0 %299 }
 0x4d8   :  { %v2453_v7 = vadd.f32 %v300_v6, %v292_v5 }
 0x4d9   :  { %v378_v10 = vpop.permute.xlu1 %377 }
 0x4da   :  { %2016 = vtanh.f32 %v2453_v7  ;;  %v2456_v11 = vadd.f32 %v378_v10, %v370_v8 }
 0x4dc   :  { %2018 = vtanh.f32 %v2456_v11  ;;  %v559_v2 = vrot.slane %v2456_v11, 6 }
 0x4e4   :  { %v2017_v19 = vpop.eup %2016 }
 0x4e5   :  { %305 = vrot.lane.b32.xlu0 %v2017_v19, %s2251_s22 }
 0x4e6   :  { %v2019_v20 = vpop.eup %2018 }
 0x4e7   :  { %383 = vrot.lane.b32.xlu1 %v2019_v20, %s2251_s22 }
 0x557   :  { %v306_v21 = vpop.permute.xlu0 %305 }
 0x558   :  { %v308_v22 = vmul.f32 %v2013_v61, %v306_v21 }
 0x559   :  { %v384_v23 = vpop.permute.xlu1 %383 }
 0x55a   :  { %v309_v24 = vpack.c.bf16 %v308_v22, %v308_v22  ;;  %v386_v25 = vmul.f32 %v2015_v1, %v384_v23 }
 0x55c   :  { %v387_v26 = vpack.c.bf16 %v386_v25, %v386_v25  ;;  %311 = vrot.lane.b32.xlu0 %v309_v24, %s2252_s2 }
 0x55e   :  { %v389_v28 = vrot.slane %v387_v26, 1 }
 0x560   :  { %390 = vrot.lane.b32.xlu1 %v389_v28, %s2252_s2 }
 0x5ce   :  { %v312_v29 = vpop.permute.xlu0 %311 }
 0x5cf   :  { %1822 = vmatmul.mubr.msk.bf16.vlgmr.msra.gmra.mrb[4].mxu1 %vm195_vm2, %v312_v29 }
 0x5d0   :  { %1834 = vmatpush3.bf16.msra.mxu1 %v2404_v27  ;;  %1837 = vmatprep.mubr.msk.bf16.mxu1 %vm2250_vm0, %v2249_v0 }
 0x5d1   :  { %1835 = vmatprep.subr.bf16.mxu1 %v2249_v0 }
 0x5d2   :  { %v391_v30 = vpop.permute.xlu1 %390 }
 0x5d3   :  { %1830 = vmatmul.mubr.msk.bf16.vlgmr.msra.gmra.mrb[8].mxu0 %vm195_vm2, %v391_v30 }
 0x5d4   :  { %1836 = vmatpush3.bf16.msra.mxu1 %v2418_v34  ;;  %1842 = vmatpush3.bf16.msra.mxu0 %v2459_v16 }
 0x5d5   :  { %1849 = vmatprep.subr.bf16.mxu1 %v2249_v0  ;;  %1843 = vmatprep.subr.bf16.mxu0 %v2249_v0 }
 0x5d6   :  { %1845 = vmatprep.mubr.msk.bf16.mxu0 %vm2250_vm0, %v2249_v0 }
 0x5d7   :  { %1838 = vmatmul.mubr.msk.bf16.vlgmr.msra.gmra.mrb[8].mxu1 %vm195_vm2, %v391_v30 }
 0x5d8   :  { %1850 = vmatpush3.bf16.msra.mxu1 %v2409_v31  ;;  %1844 = vmatpush3.bf16.msra.mxu0 %v2462_v18 }
 0x5d9   :  { %1851 = vmatprep.subr.bf16.mxu1 %v2249_v0  ;;  %1853 = vmatprep.mubr.msk.bf16.mxu1 %vm2250_vm0, %v2249_v0 }
 0x5da   :  { %1857 = vmatprep.subr.bf16.mxu0 %v2249_v0 }
 0x5dc   :  { %1852 = vmatpush3.bf16.msra.mxu1 %v2422_v35 }
 0x5dd   :  { %1865 = vmatprep.subr.bf16.mxu1 %v2249_v0 }
 0x6a2   :  { %v350_v32 = vpop.f32.mrb[4].mxu1 }
 0x6a3   :  { %v1823_v33 = vpop.f32.mrb[5].mxu1 }
 0x6a4   :  { %v353_v36 = vpop.f32.mrb[6].mxu1 }
 0x6a5   :  { %v1824_v37 = vpop.f32.mrb[7].mxu1 }
 0x6a6   :  { %v429_v38 = vpop.f32.mrb[8].mxu0 }
 0x6a7   :  { %v548_v39 = vrot.slane %v429_v38, 4  ;;  %v1831_v40 = vpop.f32.mrb[9].mxu0 }
 0x6a8   :  { %v432_v42 = vpop.f32.mrb[10].mxu0 }
 0x6a9   :  { %v550_v43 = vadd.f32 %v548_v39, %v2390_v9  ;;  %v1832_v44 = vpop.f32.mrb[11].mxu0 }
 0x6aa   :  { %v469_v45 = vpop.f32.mrb[8].mxu1 }
 0x6ab   :  { %2020 = vtanh.f32 %v550_v43  ;;  %v470_v46 = vadd.f32 %v469_v45, %v350_v32  ;;  %v1839_v47 = vpop.f32.mrb[9].mxu1  ;;  %v1694_v53 = vmul.f32 -1.442695, %v550_v43 }
 0x6ac   :  { %v472_v48 = vpop.f32.mrb[10].mxu1 }
 0x6ad   :  { %v475_v49 = vadd.f32 %v2444_v41, %v470_v46  ;;  %v1840_v50 = vpop.f32.mrb[11].mxu1 }
 0x6af   :  { %2022 = vtanh.f32 %v475_v49  ;;  %v1692_v54 = vmul.f32 -1.442695, %v475_v49 }
 0x6b0   :  { %2024 = vpow2.f32 %v1694_v53 }
 0x6b1   :  { %2026 = vpow2.f32 %v1692_v54 }
 0x6b5   :  { %v2021_v51 = vpop.eup %2020 }
 0x6b6   :  { %563 = vrot.lane.b32.xlu1 %v2021_v51, %s2251_s22 }
 0x6b9   :  { %v2023_v52 = vpop.eup %2022 }
 0x6ba   :  { %485 = vrot.lane.b32.xlu0 %v2023_v52, %s2251_s22  ;;  %v2025_v55 = vpop.eup %2024 }
 0x6bb   :  { %v554_v56 = vadd.f32 1.0, %v2025_v55  ;;  %v2027_v57 = vpop.eup %2026 }
 0x6bc   :  { %v479_v58 = vadd.f32 1.0, %v2027_v57 }
 0x6bd   :  { %2028 = vrcp.f32 %v554_v56 }
 0x6be   :  { %2030 = vrcp.f32 %v479_v58 }
 0x6c7   :  { %v2029_v59 = vpop.eup %2028 }
 0x6c8   :  { %v2031_v62 = vpop.eup %2030  ;;  %v561_v3 = vmul.f32 %v2029_v59, %v559_v2 }
 0x6c9   :  { %v483_v6 = vmul.f32 %v2031_v62, %v2453_v7 }
 0x728   :  { %v564_v60 = vpop.permute.xlu1 %563 }
 0x729   :  { %v566_v61 = vmul.f32 %v2029_v59, %v564_v60 }
 0x72b   :  { %568 = vrot.lane.b32.xlu1 %v566_v61, %s2252_s2 }
 0x72c   :  { %v486_v63 = vpop.permute.xlu0 %485 }
 0x72d   :  { %v488_v1 = vmul.f32 %v2031_v62, %v486_v63 }
 0x72f   :  { %490 = vrot.lane.b32.xlu0 %v488_v1, %s2252_s2 }
 0x79d   :  { %v569_v4 = vpop.permute.xlu1 %568 }
 0x79e   :  { %v2499_v5 = vadd.f32 %v569_v4, %v561_v3 }
 0x7a0   :  { %2032 = vtanh.f32 %v2499_v5  ;;  %v750_v58 = vrot.slane %v2499_v5, 6 }
 0x7a1   :  { %v491_v8 = vpop.permute.xlu0 %490 }
 0x7a2   :  { %v2503_v10 = vadd.f32 %v491_v8, %v483_v6 }
 0x7a4   :  { %2034 = vtanh.f32 %v2503_v10 }
 0x7aa   :  { %v2033_v13 = vpop.eup %2032 }
 0x7ab   :  { %574 = vrot.lane.b32.xlu1 %v2033_v13, %s2251_s22 }
 0x7ae   :  { %v2035_v14 = vpop.eup %2034 }
 0x7af   :  { %496 = vrot.lane.b32.xlu0 %v2035_v14, %s2251_s22 }
 0x81d   :  { %v575_v11 = vpop.permute.xlu1 %574 }
 0x81e   :  { %v577_v15 = vmul.f32 %v2029_v59, %v575_v11 }
 0x820   :  { %v578_v17 = vpack.c.bf16 %v577_v15, %v577_v15 }
 0x821   :  { %v497_v19 = vpop.permute.xlu0 %496 }
 0x822   :  { %v580_v20 = vrot.slane %v578_v17, 2  ;;  %v499_v21 = vmul.f32 %v2031_v62, %v497_v19 }
 0x824   :  { %v500_v22 = vpack.c.bf16 %v499_v21, %v499_v21  ;;  %581 = vrot.lane.b32.xlu1 %v580_v20, %s2252_s2 }
 0x826   :  { %502 = vrot.lane.b32.xlu0 %v500_v22, %s2252_s2 }
 0x896   :  { %v582_v7 = vpop.permute.xlu1 %581 }
 0x897   :  { %1854 = vmatmul.mubr.msk.bf16.vlgmr.msra.gmra.mrb[12].mxu1 %vm195_vm2, %v582_v7 }
 0x898   :  { %v503_v23 = vpop.permute.xlu0 %502  ;;  %1866 = vmatpush3.bf16.msra.mxu1 %v2459_v16  ;;  %1869 = vmatprep.mubr.msk.bf16.mxu1 %vm2250_vm0, %v2249_v0 }
 0x899   :  { %1846 = vmatmul.mubr.msk.bf16.vlgmr.msra.gmra.mrb[12].mxu0 %vm195_vm2, %v503_v23  ;;  %1867 = vmatprep.subr.bf16.mxu1 %v2249_v0 }
 0x89a   :  { %1858 = vmatpush3.bf16.msra.mxu0 %v2404_v27  ;;  %1861 = vmatprep.mubr.msk.bf16.mxu0 %vm2250_vm0, %v2249_v0 }
 0x89b   :  { %1859 = vmatprep.subr.bf16.mxu0 %v2249_v0 }
 0x89c   :  { %1868 = vmatpush3.bf16.msra.mxu1 %v2462_v18 }
 0x89d   :  { %1881 = vmatprep.subr.bf16.mxu1 %v2249_v0 }
 0x89e   :  { %1860 = vmatpush3.bf16.msra.mxu0 %v2418_v34 }
 0x89f   :  { %1873 = vmatprep.subr.bf16.mxu0 %v2249_v0 }
 0x8a1   :  { %1862 = vmatmul.mubr.msk.bf16.vlgmr.msra.gmra.mrb[16].mxu0 %vm195_vm2, %v582_v7 }
 0x8a2   :  { %1874 = vmatpush3.bf16.msra.mxu0 %v2409_v31  ;;  %1877 = vmatprep.mubr.msk.bf16.mxu0 %vm2250_vm0, %v2249_v0 }
 0x8a3   :  { %1875 = vmatprep.subr.bf16.mxu0 %v2249_v0 }
 0x8a6   :  { %1876 = vmatpush3.bf16.msra.mxu0 %v2422_v35 }
 0x8a7   :  { %1889 = vmatprep.subr.bf16.mxu0 %v2249_v0 }
 0x96a   :  { %v620_v24 = vpop.f32.mrb[12].mxu1 }
 0x96b   :  { %v739_v25 = vrot.slane %v620_v24, 2  ;;  %v1855_v26 = vpop.f32.mrb[13].mxu1 }
 0x96c   :  { %v541_v28 = vpop.f32.mrb[12].mxu0  ;;  %v623_v29 = vpop.f32.mrb[14].mxu1 }
 0x96d   :  { %v741_v30 = vadd.f32 %v739_v25, %v2390_v9  ;;  %v1847_v32 = vpop.f32.mrb[13].mxu0  ;;  %v1856_v33 = vpop.f32.mrb[15].mxu1 }
 0x96e   :  { %v544_v36 = vpop.f32.mrb[14].mxu0 }
 0x96f   :  { %2036 = vtanh.f32 %v741_v30  ;;  %v1848_v37 = vpop.f32.mrb[15].mxu0  ;;  %v1699_v9 = vmul.f32 -1.442695, %v741_v30 }
 0x974   :  { %v660_v38 = vpop.f32.mrb[16].mxu0 }
 0x975   :  { %v661_v39 = vadd.f32 %v660_v38, %v541_v28  ;;  %v1863_v40 = vpop.f32.mrb[17].mxu0 }
 0x976   :  { %v663_v42 = vpop.f32.mrb[18].mxu0 }
 0x977   :  { %v666_v43 = vadd.f32 %v2444_v41, %v661_v39  ;;  %v1864_v44 = vpop.f32.mrb[19].mxu0 }
 0x979   :  { %v2037_v45 = vpop.eup %2036  ;;  %2038 = vtanh.f32 %v666_v43  ;;  %v1697_v47 = vmul.f32 -1.442695, %v666_v43 }
 0x97a   :  { %754 = vrot.lane.b32.xlu1 %v2037_v45, %s2251_s22  ;;  %2040 = vpow2.f32 %v1699_v9 }
 0x97b   :  { %2042 = vpow2.f32 %v1697_v47 }
 0x983   :  { %v2039_v46 = vpop.eup %2038 }
 0x984   :  { %676 = vrot.lane.b32.xlu0 %v2039_v46, %s2251_s22  ;;  %v2041_v48 = vpop.eup %2040 }
 0x985   :  { %v745_v49 = vadd.f32 1.0, %v2041_v48  ;;  %v2043_v50 = vpop.eup %2042 }
 0x986   :  { %v670_v51 = vadd.f32 1.0, %v2043_v50 }
 0x987   :  { %2044 = vrcp.f32 %v745_v49 }
 0x988   :  { %2046 = vrcp.f32 %v670_v51 }
 0x991   :  { %v2045_v52 = vpop.eup %2044 }
 0x992   :  { %v2047_v55 = vpop.eup %2046  ;;  %v752_v59 = vmul.f32 %v2045_v52, %v750_v58 }
 0x993   :  { %v674_v62 = vmul.f32 %v2047_v55, %v2503_v10 }
 0x9ec   :  { %v755_v53 = vpop.permute.xlu1 %754 }
 0x9ed   :  { %v757_v54 = vmul.f32 %v2045_v52, %v755_v53 }
 0x9ef   :  { %759 = vrot.lane.b32.xlu1 %v757_v54, %s2252_s2 }
 0x9f6   :  { %v677_v56 = vpop.permute.xlu0 %676 }
 0x9f7   :  { %v679_v57 = vmul.f32 %v2047_v55, %v677_v56 }
 0x9f9   :  { %681 = vrot.lane.b32.xlu0 %v679_v57, %s2252_s2 }
 0xa61   :  { %v760_v60 = vpop.permute.xlu1 %759 }
 0xa62   :  { %v2538_v61 = vadd.f32 %v760_v60, %v752_v59 }
 0xa64   :  { %2048 = vtanh.f32 %v2538_v61  ;;  %v938_v50 = vrot.slane %v2538_v61, 6 }
 0xa6b   :  { %v682_v63 = vpop.permute.xlu0 %681 }
 0xa6c   :  { %v2542_v1 = vadd.f32 %v682_v63, %v674_v62 }
 0xa6e   :  { %v2049_v2 = vpop.eup %2048  ;;  %2050 = vtanh.f32 %v2542_v1 }
 0xa6f   :  { %765 = vrot.lane.b32.xlu1 %v2049_v2, %s2251_s22 }
 0xa78   :  { %v2051_v3 = vpop.eup %2050 }
 0xa79   :  { %687 = vrot.lane.b32.xlu0 %v2051_v3, %s2251_s22 }
 0xae1   :  { %v766_v4 = vpop.permute.xlu1 %765 }
 0xae2   :  { %v768_v5 = vmul.f32 %v2045_v52, %v766_v4 }
 0xae4   :  { %v769_v6 = vpack.c.bf16 %v768_v5, %v768_v5 }
 0xae6   :  { %v771_v8 = vrot.slane %v769_v6, 3 }
 0xae8   :  { %772 = vrot.lane.b32.xlu1 %v771_v8, %s2252_s2 }
 0xaeb   :  { %v688_v13 = vpop.permute.xlu0 %687 }
 0xaec   :  { %v690_v14 = vmul.f32 %v2047_v55, %v688_v13 }
 0xaee   :  { %v691_v10 = vpack.c.bf16 %v690_v14, %v690_v14 }
 0xaf0   :  { %693 = vrot.lane.b32.xlu0 %v691_v10, %s2252_s2 }
 0xb5a   :  { %v773_v11 = vpop.permute.xlu1 %772 }
 0xb5b   :  { %1878 = vmatmul.mubr.msk.bf16.vlgmr.msra.gmra.mrb[20].mxu0 %vm195_vm2, %v773_v11 }
 0xb5c   :  { %1890 = vmatpush3.bf16.msra.mxu0 %v2459_v16  ;;  %1893 = vmatprep.mubr.msk.bf16.mxu0 %vm2250_vm0, %v2249_v0 }
 0xb5d   :  { %1891 = vmatprep.subr.bf16.mxu0 %v2249_v0 }
 0xb60   :  { %1892 = vmatpush3.bf16.msra.mxu0 %v2462_v18 }
 0xb61   :  { %1905 = vmatprep.subr.bf16.mxu0 %v2249_v0 }
 0xb62   :  { %v694_v15 = vpop.permute.xlu0 %693 }
 0xb63   :  { %1870 = vmatmul.mubr.msk.bf16.vlgmr.msra.gmra.mrb[16].mxu1 %vm195_vm2, %v694_v15 }
 0xb64   :  { %1882 = vmatpush3.bf16.msra.mxu1 %v2404_v27  ;;  %1885 = vmatprep.mubr.msk.bf16.mxu1 %vm2250_vm0, %v2249_v0 }
 0xb65   :  { %1883 = vmatprep.subr.bf16.mxu1 %v2249_v0 }
 0xb68   :  { %1884 = vmatpush3.bf16.msra.mxu1 %v2418_v34 }
 0xb69   :  { %1897 = vmatprep.subr.bf16.mxu1 %v2249_v0 }
 0xb6b   :  { %1886 = vmatmul.mubr.msk.bf16.vlgmr.msra.gmra.mrb[20].mxu1 %vm195_vm2, %v773_v11 }
 0xb6c   :  { %1898 = vmatpush3.bf16.msra.mxu1 %v2409_v31  ;;  %1901 = vmatprep.mubr.msk.bf16.mxu1 %vm2250_vm0, %v2249_v0 }
 0xb6d   :  { %1899 = vmatprep.subr.bf16.mxu1 %v2249_v0 }
 0xb70   :  { %1900 = vmatpush3.bf16.msra.mxu1 %v2422_v35 }
 0xb71   :  { %1913 = vmatprep.subr.bf16.mxu1 %v2249_v0 }
 0xc2e   :  { %v811_v17 = vpop.f32.mrb[20].mxu0 }
 0xc2f   :  { %v929_v19 = vadd.f32 %v811_v17, %v2392_v12  ;;  %v1879_v20 = vpop.f32.mrb[21].mxu0 }
 0xc30   :  { %v814_v21 = vpop.f32.mrb[22].mxu0 }
 0xc31   :  { %2052 = vtanh.f32 %v929_v19  ;;  %v1880_v22 = vpop.f32.mrb[23].mxu0  ;;  %v1704_v38 = vmul.f32 -1.442695, %v929_v19 }
 0xc36   :  { %v732_v7 = vpop.f32.mrb[16].mxu1 }
 0xc37   :  { %v1871_v23 = vpop.f32.mrb[17].mxu1 }
 0xc38   :  { %v735_v24 = vpop.f32.mrb[18].mxu1 }
 0xc39   :  { %v1872_v25 = vpop.f32.mrb[19].mxu1 }
 0xc3b   :  { %v2053_v26 = vpop.eup %2052 }
 0xc3c   :  { %942 = vrot.lane.b32.xlu1 %v2053_v26, %s2251_s22 }
 0xc3e   :  { %v851_v28 = vpop.f32.mrb[20].mxu1 }
 0xc3f   :  { %v852_v29 = vadd.f32 %v851_v28, %v732_v7  ;;  %v1887_v30 = vpop.f32.mrb[21].mxu1 }
 0xc40   :  { %v854_v32 = vpop.f32.mrb[22].mxu1 }
 0xc41   :  { %v857_v33 = vadd.f32 %v2444_v41, %v852_v29  ;;  %v1888_v36 = vpop.f32.mrb[23].mxu1 }
 0xc43   :  { %2054 = vtanh.f32 %v857_v33  ;;  %v1702_v42 = vmul.f32 -1.442695, %v857_v33 }
 0xc44   :  { %2056 = vpow2.f32 %v1704_v38 }
 0xc4d   :  { %v2055_v37 = vpop.eup %2054 }
 0xc4e   :  { %867 = vrot.lane.b32.xlu0 %v2055_v37, %s2251_s22  ;;  %v2057_v39 = vpop.eup %2056 }
 0xc4f   :  { %v933_v40 = vadd.f32 1.0, %v2057_v39 }
 0xc51   :  { %2058 = vrcp.f32 %v933_v40 }
 0xc52   :  { %2060 = vpow2.f32 %v1702_v42 }
 0xc5b   :  { %v2059_v43 = vpop.eup %2058 }
 0xc5c   :  { %v2061_v45 = vpop.eup %2060  ;;  %v940_v51 = vmul.f32 %v2059_v43, %v938_v50 }
 0xc5d   :  { %v861_v9 = vadd.f32 1.0, %v2061_v45 }
 0xc5f   :  { %2062 = vrcp.f32 %v861_v9 }
 0xc69   :  { %v2063_v47 = vpop.eup %2062 }
 0xc6a   :  { %v865_v55 = vmul.f32 %v2063_v47, %v2542_v1 }
 0xcae   :  { %v943_v44 = vpop.permute.xlu1 %942 }
 0xcaf   :  { %v945_v46 = vmul.f32 %v2059_v43, %v943_v44 }
 0xcb1   :  { %947 = vrot.lane.b32.xlu1 %v945_v46, %s2252_s2 }
 0xcc0   :  { %v868_v48 = vpop.permute.xlu0 %867 }
 0xcc1   :  { %v870_v49 = vmul.f32 %v2063_v47, %v868_v48 }
 0xcc3   :  { %872 = vrot.lane.b32.xlu0 %v870_v49, %s2252_s2 }
 0xd23   :  { %v948_v52 = vpop.permute.xlu1 %947 }
 0xd24   :  { %v2577_v53 = vadd.f32 %v948_v52, %v940_v51 }
 0xd26   :  { %2064 = vtanh.f32 %v2577_v53 }
 0xd30   :  { %v2065_v54 = vpop.eup %2064 }
 0xd31   :  { %953 = vrot.lane.b32.xlu1 %v2065_v54, %s2251_s22 }
 0xd35   :  { %v873_v56 = vpop.permute.xlu0 %872 }
 0xd36   :  { %v2582_v57 = vadd.f32 %v873_v56, %v865_v55 }
 0xd38   :  { %2066 = vtanh.f32 %v2582_v57 }
 0xd42   :  { %v2067_v58 = vpop.eup %2066 }
 0xd43   :  { %878 = vrot.lane.b32.xlu0 %v2067_v58, %s2251_s22 }
 0xda3   :  { %v954_v59 = vpop.permute.xlu1 %953 }
 0xda4   :  { %v956_v60 = vmul.f32 %v2059_v43, %v954_v59  ;;  %v1128_v43 = vrot.slane %v2577_v53, 6 }
 0xda6   :  { %v957_v61 = vpack.c.bf16 %v956_v60, %v956_v60 }
 0xda8   :  { %959 = vrot.lane.b32.xlu1 %v957_v61, %s2252_s2 }
 0xdb5   :  { %v879_v62 = vpop.permute.xlu0 %878 }
 0xdb6   :  { %v881_v63 = vmul.f32 %v2063_v47, %v879_v62 }
 0xdb8   :  { %v882_v2 = vpack.c.bf16 %v881_v63, %v881_v63 }
 0xdba   :  { %884 = vrot.lane.b32.xlu0 %v882_v2, %s2252_s2 }
 0xe1a   :  { %v960_v3 = vpop.permute.xlu1 %959 }
 0xe1b   :  { %1902 = vmatmul.mubr.msk.bf16.vlgmr.msra.gmra.mrb[24].mxu1 %vm195_vm2, %v960_v3 }
 0xe1c   :  { %1914 = vmatpush3.bf16.msra.mxu1 %v2459_v16  ;;  %1917 = vmatprep.mubr.msk.bf16.mxu1 %vm2250_vm0, %v2249_v0 }
 0xe1d   :  { %1915 = vmatprep.subr.bf16.mxu1 %v2249_v0 }
 0xe20   :  { %1916 = vmatpush3.bf16.msra.mxu1 %v2462_v18 }
 0xe21   :  { %1929 = vmatprep.subr.bf16.mxu1 %v2249_v0 }
 0xe2c   :  { %v885_v1 = vpop.permute.xlu0 %884 }
 0xe2d   :  { %1894 = vmatmul.mubr.msk.bf16.vlgmr.msra.gmra.mrb[24].mxu0 %vm195_vm2, %v885_v1 }
 0xe2e   :  { %1906 = vmatpush3.bf16.msra.mxu0 %v2404_v27  ;;  %1909 = vmatprep.mubr.msk.bf16.mxu0 %vm2250_vm0, %v2249_v0 }
 0xe2f   :  { %1907 = vmatprep.subr.bf16.mxu0 %v2249_v0 }
 0xe32   :  { %1908 = vmatpush3.bf16.msra.mxu0 %v2418_v34 }
 0xe33   :  { %1921 = vmatprep.subr.bf16.mxu0 %v2249_v0 }
 0xe35   :  { %1910 = vmatmul.mubr.msk.bf16.vlgmr.msra.gmra.mrb[28].mxu0 %vm195_vm2, %v960_v3 }
 0xe36   :  { %1922 = vmatpush3.bf16.msra.mxu0 %v2409_v31  ;;  %1925 = vmatprep.mubr.msk.bf16.mxu0 %vm2250_vm0, %v2249_v0 }
 0xe37   :  { %1923 = vmatprep.subr.bf16.mxu0 %v2249_v0 }
 0xe3a   :  { %1924 = vmatpush3.bf16.msra.mxu0 %v2422_v35 }
 0xe3b   :  { %1937 = vmatprep.subr.bf16.mxu0 %v2249_v0 }
 0xeee   :  { %v998_v4 = vpop.f32.mrb[24].mxu1 }
 0xeef   :  { %v1117_v5 = vrot.slane %v998_v4, 6  ;;  %v1903_v6 = vpop.f32.mrb[25].mxu1 }
 0xef0   :  { %v1001_v8 = vpop.f32.mrb[26].mxu1 }
 0xef1   :  { %v1119_v13 = vadd.f32 %v1117_v5, %v2392_v12  ;;  %v1904_v14 = vpop.f32.mrb[27].mxu1 }
 0xef3   :  { %2068 = vtanh.f32 %v1119_v13  ;;  %v1709_v26 = vmul.f32 -1.442695, %v1119_v13 }
 0xefd   :  { %v2069_v10 = vpop.eup %2068 }
 0xefe   :  { %1132 = vrot.lane.b32.xlu1 %v2069_v10, %s2251_s22 }
 0xf00   :  { %v923_v11 = vpop.f32.mrb[24].mxu0 }
 0xf01   :  { %v1895_v15 = vpop.f32.mrb[25].mxu0 }
 0xf02   :  { %v926_v17 = vpop.f32.mrb[26].mxu0 }
 0xf03   :  { %v1896_v19 = vpop.f32.mrb[27].mxu0 }
 0xf08   :  { %v1038_v20 = vpop.f32.mrb[28].mxu0 }
 0xf09   :  { %v1039_v21 = vadd.f32 %v1038_v20, %v923_v11  ;;  %v1911_v22 = vpop.f32.mrb[29].mxu0 }
 0xf0a   :  { %v1041_v7 = vpop.f32.mrb[30].mxu0 }
 0xf0b   :  { %v1044_v23 = vadd.f32 %v2444_v41, %v1039_v21  ;;  %v1912_v24 = vpop.f32.mrb[31].mxu0 }
 0xf0d   :  { %2070 = vtanh.f32 %v1044_v23  ;;  %v1707_v30 = vmul.f32 -1.442695, %v1044_v23 }
 0xf0e   :  { %2072 = vpow2.f32 %v1709_v26 }
 0xf17   :  { %v2071_v25 = vpop.eup %2070 }
 0xf18   :  { %1054 = vrot.lane.b32.xlu0 %v2071_v25, %s2251_s22  ;;  %v2073_v28 = vpop.eup %2072 }
 0xf19   :  { %v1123_v29 = vadd.f32 1.0, %v2073_v28 }
 0xf1b   :  { %2074 = vrcp.f32 %v1123_v29 }
 0xf1c   :  { %2076 = vpow2.f32 %v1707_v30 }
 0xf25   :  { %v2075_v32 = vpop.eup %2074 }
 0xf26   :  { %v2077_v37 = vpop.eup %2076  ;;  %v1130_v44 = vmul.f32 %v2075_v32, %v1128_v43 }
 0xf27   :  { %v1048_v38 = vadd.f32 1.0, %v2077_v37 }
 0xf29   :  { %2078 = vrcp.f32 %v1048_v38 }
 0xf33   :  { %v2079_v39 = vpop.eup %2078 }
 0xf34   :  { %v1052_v47 = vmul.f32 %v2079_v39, %v2582_v57 }
 0xf70   :  { %v1133_v33 = vpop.permute.xlu1 %1132 }
 0xf71   :  { %v1135_v36 = vmul.f32 %v2075_v32, %v1133_v33 }
 0xf73   :  { %1137 = vrot.lane.b32.xlu1 %v1135_v36, %s2252_s2 }
 0xf8a   :  { %v1055_v40 = vpop.permute.xlu0 %1054 }
 0xf8b   :  { %v1057_v42 = vmul.f32 %v2079_v39, %v1055_v40 }
 0xf8d   :  { %1059 = vrot.lane.b32.xlu0 %v1057_v42, %s2252_s2 }
 0xfe5   :  { %v1138_v45 = vpop.permute.xlu1 %1137 }
 0xfe6   :  { %v2616_v46 = vadd.f32 %v1138_v45, %v1130_v44 }
 0xfe8   :  { %2080 = vtanh.f32 %v2616_v46  ;;  %v1319_v29 = vrot.slane %v2616_v46, 6 }
 0xff2   :  { %v2081_v9 = vpop.eup %2080 }
 0xff3   :  { %1143 = vrot.lane.b32.xlu1 %v2081_v9, %s2251_s22 }
 0xfff   :  { %v1060_v48 = vpop.permute.xlu0 %1059 }
0x1000   :  { %v2621_v49 = vadd.f32 %v1060_v48, %v1052_v47 }
0x1002   :  { %2082 = vtanh.f32 %v2621_v49 }
0x100c   :  { %v2083_v50 = vpop.eup %2082 }
0x100d   :  { %1065 = vrot.lane.b32.xlu0 %v2083_v50, %s2251_s22 }
0x1065   :  { %v1144_v51 = vpop.permute.xlu1 %1143 }
0x1066   :  { %v1146_v52 = vmul.f32 %v2075_v32, %v1144_v51 }
0x1068   :  { %v1147_v53 = vpack.c.bf16 %v1146_v52, %v1146_v52 }
0x106a   :  { %v1149_v54 = vrot.slane %v1147_v53, 1 }
0x106c   :  { %1150 = vrot.lane.b32.xlu1 %v1149_v54, %s2252_s2 }
0x107f   :  { %v1066_v55 = vpop.permute.xlu0 %1065 }
0x1080   :  { %v1068_v56 = vmul.f32 %v2079_v39, %v1066_v55 }
0x1082   :  { %v1069_v58 = vpack.c.bf16 %v1068_v56, %v1068_v56 }
0x1084   :  { %1071 = vrot.lane.b32.xlu0 %v1069_v58, %s2252_s2 }
0x10de   :  { %v1151_v57 = vpop.permute.xlu1 %1150 }
0x10df   :  { %1926 = vmatmul.mubr.msk.bf16.vlgmr.msra.gmra.mrb[32].mxu0 %vm195_vm2, %v1151_v57 }
0x10e0   :  { %1938 = vmatpush3.bf16.msra.mxu0 %v2459_v16  ;;  %1941 = vmatprep.mubr.msk.bf16.mxu0 %vm2250_vm0, %v2249_v0 }
0x10e1   :  { %1939 = vmatprep.subr.bf16.mxu0 %v2249_v0 }
0x10e4   :  { %1940 = vmatpush3.bf16.msra.mxu0 %v2462_v18 }
0x10e5   :  { %1953 = vmatprep.subr.bf16.mxu0 %v2249_v0 }
0x10f6   :  { %v1072_v59 = vpop.permute.xlu0 %1071 }
0x10f7   :  { %1918 = vmatmul.mubr.msk.bf16.vlgmr.msra.gmra.mrb[28].mxu1 %vm195_vm2, %v1072_v59 }
0x10f8   :  { %1930 = vmatpush3.bf16.msra.mxu1 %v2404_v27  ;;  %1933 = vmatprep.mubr.msk.bf16.mxu1 %vm2250_vm0, %v2249_v0 }
0x10f9   :  { %1931 = vmatprep.subr.bf16.mxu1 %v2249_v0 }
0x10fc   :  { %1932 = vmatpush3.bf16.msra.mxu1 %v2418_v34 }
0x10fd   :  { %1945 = vmatprep.subr.bf16.mxu1 %v2249_v0 }
0x10ff   :  { %1934 = vmatmul.mubr.msk.bf16.vlgmr.msra.gmra.mrb[32].mxu1 %vm195_vm2, %v1151_v57 }
0x1100   :  { %1946 = vmatpush3.bf16.msra.mxu1 %v2409_v31  ;;  %1949 = vmatprep.mubr.msk.bf16.mxu1 %vm2250_vm0, %v2249_v0 }
0x1101   :  { %1947 = vmatprep.subr.bf16.mxu1 %v2249_v0 }
0x1104   :  { %1948 = vmatpush3.bf16.msra.mxu1 %v2422_v35 }
0x1105   :  { %1961 = vmatprep.subr.bf16.mxu1 %v2249_v0 }
0x11b2   :  { %v1189_v60 = vpop.f32.mrb[32].mxu0 }
0x11b3   :  { %v1308_v61 = vrot.slane %v1189_v60, 4  ;;  %v1927_v62 = vpop.f32.mrb[33].mxu0 }
0x11b4   :  { %v1192_v63 = vpop.f32.mrb[34].mxu0 }
0x11b5   :  { %v1310_v2 = vadd.f32 %v1308_v61, %v2392_v12  ;;  %v1928_v3 = vpop.f32.mrb[35].mxu0 }
0x11b7   :  { %2084 = vtanh.f32 %v1310_v2  ;;  %v1714_v17 = vmul.f32 -1.442695, %v1310_v2 }
0x11c1   :  { %v2085_v1 = vpop.eup %2084 }
0x11c2   :  { %1323 = vrot.lane.b32.xlu1 %v2085_v1, %s2251_s22 }
0x11ca   :  { %v1110_v31 = vpop.f32.mrb[28].mxu1 }
0x11cb   :  { %v1919_v4 = vpop.f32.mrb[29].mxu1 }
0x11cc   :  { %v1113_v5 = vpop.f32.mrb[30].mxu1 }
0x11cd   :  { %v1920_v6 = vpop.f32.mrb[31].mxu1 }
0x11d2   :  { %v1229_v8 = vpop.f32.mrb[32].mxu1 }
0x11d3   :  { %v1230_v13 = vadd.f32 %v1229_v8, %v1110_v31  ;;  %v1935_v35 = vpop.f32.mrb[33].mxu1 }
0x11d4   :  { %v1232_v14 = vpop.f32.mrb[34].mxu1 }
0x11d5   :  { %v1235_v10 = vadd.f32 %v2444_v41, %v1230_v13  ;;  %v1936_v11 = vpop.f32.mrb[35].mxu1 }
0x11d7   :  { %2086 = vtanh.f32 %v1235_v10  ;;  %v1712_v7 = vmul.f32 -1.442695, %v1235_v10 }
0x11d8   :  { %2088 = vpow2.f32 %v1714_v17 }
0x11e1   :  { %v2087_v15 = vpop.eup %2086 }
0x11e2   :  { %1245 = vrot.lane.b32.xlu0 %v2087_v15, %s2251_s22  ;;  %v2089_v19 = vpop.eup %2088 }
0x11e3   :  { %v1314_v20 = vadd.f32 1.0, %v2089_v19 }
0x11e5   :  { %2090 = vrcp.f32 %v1314_v20 }
0x11e6   :  { %2092 = vpow2.f32 %v1712_v7 }
0x11ef   :  { %v2091_v21 = vpop.eup %2090 }
0x11f0   :  { %v2093_v24 = vpop.eup %2092  ;;  %v1321_v30 = vmul.f32 %v2091_v21, %v1319_v29 }
0x11f1   :  { %v1239_v25 = vadd.f32 1.0, %v2093_v24 }
0x11f3   :  { %2094 = vrcp.f32 %v1239_v25 }
0x11fd   :  { %v2095_v41 = vpop.eup %2094 }
0x11fe   :  { %v1243_v37 = vmul.f32 %v2095_v41, %v2621_v49 }
0x1234   :  { %v1324_v22 = vpop.permute.xlu1 %1323 }
0x1235   :  { %v1326_v23 = vmul.f32 %v2091_v21, %v1324_v22 }
0x1237   :  { %1328 = vrot.lane.b32.xlu1 %v1326_v23, %s2252_s2 }
0x1254   :  { %v1246_v26 = vpop.permute.xlu0 %1245 }
0x1255   :  { %v1248_v28 = vmul.f32 %v2095_v41, %v1246_v26 }
0x1257   :  { %1250 = vrot.lane.b32.xlu0 %v1248_v28, %s2252_s2 }
0x12a9   :  { %v1329_v32 = vpop.permute.xlu1 %1328 }
0x12aa   :  { %v2655_v33 = vadd.f32 %v1329_v32, %v1321_v30 }
0x12ac   :  { %2096 = vtanh.f32 %v2655_v33  ;;  %v1510_v11 = vrot.slane %v2655_v33, 6 }
0x12b6   :  { %v2097_v36 = vpop.eup %2096 }
0x12b7   :  { %1334 = vrot.lane.b32.xlu1 %v2097_v36, %s2251_s22 }
0x12c9   :  { %v1251_v38 = vpop.permute.xlu0 %1250 }
0x12ca   :  { %v2660_v39 = vadd.f32 %v1251_v38, %v1243_v37 }
0x12cc   :  { %2098 = vtanh.f32 %v2660_v39 }
0x12d6   :  { %v2099_v40 = vpop.eup %2098 }
0x12d7   :  { %1256 = vrot.lane.b32.xlu0 %v2099_v40, %s2251_s22 }
0x1329   :  { %v1335_v42 = vpop.permute.xlu1 %1334 }
0x132a   :  { %v1337_v43 = vmul.f32 %v2091_v21, %v1335_v42 }
0x132c   :  { %v1338_v44 = vpack.c.bf16 %v1337_v43, %v1337_v43 }
0x132e   :  { %v1340_v45 = vrot.slane %v1338_v44, 2 }
0x1330   :  { %1341 = vrot.lane.b32.xlu1 %v1340_v45, %s2252_s2 }
0x1349   :  { %v1257_v46 = vpop.permute.xlu0 %1256 }
0x134a   :  { %v1259_v9 = vmul.f32 %v2095_v41, %v1257_v46 }
0x134c   :  { %v1260_v47 = vpack.c.bf16 %v1259_v9, %v1259_v9 }
0x134e   :  { %1262 = vrot.lane.b32.xlu0 %v1260_v47, %s2252_s2 }
0x13a2   :  { %v1342_v48 = vpop.permute.xlu1 %1341 }
0x13a3   :  { %1950 = vmatmul.mubr.msk.bf16.vlgmr.msra.gmra.mrb[36].mxu1 %vm195_vm2, %v1342_v48 }
0x13a4   :  { %1962 = vmatpush3.bf16.msra.mxu1 %v2459_v16  ;;  %1965 = vmatprep.mubr.msk.bf16.mxu1 %vm2250_vm0, %v2249_v0 }
0x13a5   :  { %1963 = vmatprep.subr.bf16.mxu1 %v2249_v0 }
0x13a8   :  { %1964 = vmatpush3.bf16.msra.mxu1 %v2462_v18 }
0x13a9   :  { %1977 = vmatprep.subr.bf16.mxu1 %v2249_v0 }
0x13c0   :  { %v1263_v49 = vpop.permute.xlu0 %1262 }
0x13c1   :  { %1942 = vmatmul.mubr.msk.bf16.vlgmr.msra.gmra.mrb[36].mxu0 %vm195_vm2, %v1263_v49 }
0x13c2   :  { %1954 = vmatpush3.bf16.msra.mxu0 %v2404_v27  ;;  %1957 = vmatprep.mubr.msk.bf16.mxu0 %vm2250_vm0, %v2249_v0 }
0x13c3   :  { %1955 = vmatprep.subr.bf16.mxu0 %v2249_v0 }
0x13c6   :  { %1956 = vmatpush3.bf16.msra.mxu0 %v2418_v34 }
0x13c7   :  { %1969 = vmatprep.subr.bf16.mxu0 %v2249_v0 }
0x13c9   :  { %1958 = vmatmul.mubr.msk.bf16.vlgmr.msra.gmra.mrb[40].mxu0 %vm195_vm2, %v1342_v48 }
0x13ca   :  { %1970 = vmatpush3.bf16.msra.mxu0 %v2404_v27  ;;  %1973 = vmatprep.mubr.msk.bf16.mxu0 %vm2250_vm0, %v2249_v0 }
0x13cb   :  { %1971 = vmatprep.subr.bf16.mxu0 %v2249_v0 }
0x13ce   :  { %1972 = vmatpush3.bf16.msra.mxu0 %v2418_v34  ;;  %v2124_v34 = vld [vmem:[%s2743_s6] ss:$0 sm:$0xff] }
0x1476   :  { %v1380_v16 = vpop.f32.mrb[36].mxu1 }
0x1477   :  { %v1499_v18 = vrot.slane %v1380_v16, 2  ;;  %v1951_v50 = vpop.f32.mrb[37].mxu1 }
0x1478   :  { %v1383_v51 = vpop.f32.mrb[38].mxu1 }
0x1479   :  { %v1501_v52 = vadd.f32 %v1499_v18, %v2392_v12  ;;  %v1952_v53 = vpop.f32.mrb[39].mxu1 }
0x147b   :  { %2100 = vtanh.f32 %v1501_v52  ;;  %v1719_v2 = vmul.f32 -1.442695, %v1501_v52 }
0x1485   :  { %v2101_v54 = vpop.eup %2100 }
0x1486   :  { %1514 = vrot.lane.b32.xlu0 %v2101_v54, %s2251_s22  ;;  %v1603_v54 = vld [vmem:[%s2744_s7] sm:$0xff] }
0x1494   :  { %v1301_v55 = vpop.f32.mrb[36].mxu0 }
0x1495   :  { %v1943_v27 = vpop.f32.mrb[37].mxu0 }
0x1496   :  { %v1304_v56 = vpop.f32.mrb[38].mxu0  ;;  %v1605_v27 = vld [vmem:[%s2744_s7 + $0x10] sm:$0xff] }
0x1497   :  { %v1944_v58 = vpop.f32.mrb[39].mxu0 }
0x1498   :  { %v1606_v58 = vld [vmem:[%s2744_s7 + $0x18] sm:$0xff] }
0x149c   :  { %v1420_v57 = vpop.f32.mrb[40].mxu0 }
0x149d   :  { %v1421_v59 = vadd.f32 %v1420_v57, %v1301_v55  ;;  %v1959_v60 = vpop.f32.mrb[41].mxu0  ;;  %v1604_v55 = vld [vmem:[%s2744_s7 + $0x8] sm:$0xff]  ;;  %v1608_v57 = vpack.c.bf16 %v1606_v58, %v1605_v27  ;;  %s2253_s7 = smov [#allocation10]  }
0x149e   :  { %v1423_v61 = vpop.f32.mrb[42].mxu0  ;;  %v1607_v56 = vpack.c.bf16 %v1604_v55, %v1603_v54  ;;  %s1670_s4 = sshll.u32 %s2253_s7, 4  ;;  %s1671_s4 = int_to_ptr.vmem [resolvable:$true] %s1670_s4 }
0x149f   :  { %v1426_v62 = vadd.f32 %v2124_v34, %v1421_v59  ;;  %v1960_v63 = vpop.f32.mrb[43].mxu0  ;;  %s2213_s15 = scalar_lea.vmem %s1671_s4, 32  ;;  %p2218_p5 = scmp.lt.s32.totalorder %s1671_s4, %s1671_s4 }
0x14a0   :  { %v1722_v63 = vld [vmem:[%s2745_s8] ss:$0 sm:$0xff]  ;;  %p2214_p4 = scmp.ne.s32.totalorder %s1671_s4, %s2213_s15  ;;  %p2219_p6 = scmp.lt.s32.totalorder %s2213_s15, %s2213_s15 }
0x14a1   :  { %2102 = vtanh.f32 %v1426_v62  ;;  %v1717_v6 = vmul.f32 -1.442695, %v1426_v62 }
0x14a2   :  { %2104 = vpow2.f32 %v1719_v2  ;;  %p2220_p7 = por %p2219_p6, %p2218_p5 }
0x14a4   :  { %p2221_p8 = pnand %p2220_p7, %p2214_p4 }
0x14ab   :  { %v2103_v12 = vpop.eup %2102 }
0x14ac   :  { %1436 = vrot.lane.b32.xlu1 %v2103_v12, %s2251_s22  ;;  %v2105_v3 = vpop.eup %2104 }
0x14ad   :  { %v1505_v1 = vadd.f32 1.0, %v2105_v3 }
0x14af   :  { %2106 = vrcp.f32 %v1505_v1 }
0x14b0   :  { %2108 = vpow2.f32 %v1717_v6 }
0x14b9   :  { %v2107_v31 = vpop.eup %2106 }
0x14ba   :  { %v2109_v8 = vpop.eup %2108  ;;  %v1512_v15 = vmul.f32 %v2107_v31, %v1510_v11 }
0x14bb   :  { %v1430_v13 = vadd.f32 1.0, %v2109_v8 }
0x14bd   :  { %2110 = vrcp.f32 %v1430_v13 }
0x14c7   :  { %v2111_v35 = vpop.eup %2110 }
0x14c8   :  { %v1434_v21 = vmul.f32 %v2111_v35, %v2660_v39 }
0x14f8   :  { %v1515_v4 = vpop.permute.xlu0 %1514 }
0x14f9   :  { %v1517_v5 = vmul.f32 %v2107_v31, %v1515_v4 }
0x14fb   :  { %1519 = vrot.lane.b32.xlu0 %v1517_v5, %s2252_s2 }
0x151e   :  { %v1437_v14 = vpop.permute.xlu1 %1436 }
0x151f   :  { %v1439_v10 = vmul.f32 %v2111_v35, %v1437_v14 }
0x1521   :  { %1441 = vrot.lane.b32.xlu1 %v1439_v10, %s2252_s2 }
0x156d   :  { %v1520_v17 = vpop.permute.xlu0 %1519 }
0x156e   :  { %v1522_v19 = vadd.f32 %v1520_v17, %v1512_v15 }
0x1570   :  { %2112 = vtanh.f32 %v1522_v19 }
0x157a   :  { %v2113_v20 = vpop.eup %2112 }
0x157b   :  { %1525 = vrot.lane.b32.xlu0 %v2113_v20, %s2251_s22 }
0x1593   :  { %v1442_v22 = vpop.permute.xlu1 %1441 }
0x1594   :  { %v1444_v7 = vadd.f32 %v1442_v22, %v1434_v21 }
0x1596   :  { %2114 = vtanh.f32 %v1444_v7 }
0x15a0   :  { %v2115_v23 = vpop.eup %2114 }
0x15a1   :  { %1447 = vrot.lane.b32.xlu1 %v2115_v23, %s2251_s22 }
0x15ed   :  { %v1526_v24 = vpop.permute.xlu0 %1525 }
0x15ee   :  { %v1528_v25 = vmul.f32 %v2107_v31, %v1526_v24 }
0x15f0   :  { %v1529_v41 = vpack.c.bf16 %v1528_v25, %v1528_v25 }
0x15f2   :  { %v1531_v26 = vrot.slane %v1529_v41, 3 }
0x15f4   :  { %1532 = vrot.lane.b32.xlu1 %v1531_v26, %s2252_s2 }
0x1613   :  { %v1448_v28 = vpop.permute.xlu1 %1447 }
0x1614   :  { %v1450_v29 = vmul.f32 %v2111_v35, %v1448_v28 }
0x1616   :  { %v1451_v30 = vpack.c.bf16 %v1450_v29, %v1450_v29 }
0x1618   :  { %1453 = vrot.lane.b32.xlu0 %v1451_v30, %s2252_s2 }
0x1666   :  { %v1533_v32 = vpop.permute.xlu1 %1532 }
0x1667   :  { %1974 = vmatmul.mubr.msk.bf16.vlgmr.msra.gmra.mrb[44].mxu0 %vm195_vm2, %v1533_v32 }
0x168a   :  { %v1454_v33 = vpop.permute.xlu0 %1453 }
0x168b   :  { %1966 = vmatmul.mubr.msk.bf16.vlgmr.msra.gmra.mrb[40].mxu1 %vm195_vm2, %v1454_v33 }
0x168c   :  { %1981 = vmatprep.mubr.msk.bf16.mxu1 %vm2250_vm0, %v2249_v0  ;;  %1978 = vmatpush3.bf16.msra.mxu1 %v1607_v56 }
0x168d   :  { %1979 = vmatprep.subr.bf16.mxu1 %v2249_v0 }
0x1690   :  { %1980 = vmatpush3.bf16.msra.mxu1 %v1608_v57 }
0x173a   :  { %v1571_v36 = vpop.f32.mrb[44].mxu0 }
0x173b   :  { %v1975_v37 = vpop.f32.mrb[45].mxu0 }
0x173c   :  { %v1574_v38 = vpop.f32.mrb[46].mxu0 }
0x173d   :  { %v1976_v39 = vpop.f32.mrb[47].mxu0 }
0x175e   :  { %v1492_v40 = vpop.f32.mrb[40].mxu1 }
0x175f   :  { %v1572_v42 = vadd.f32 %v1571_v36, %v1492_v40  ;;  %v1967_v43 = vpop.f32.mrb[41].mxu1 }
0x1760   :  { %v1495_v44 = vpop.f32.mrb[42].mxu1 }
0x1761   :  { %v1577_v45 = vadd.f32 %v2124_v34, %v1572_v42  ;;  %v1968_v46 = vpop.f32.mrb[43].mxu1 }
0x1763   :  { %2116 = vtanh.f32 %v1577_v45  ;;  %v1721_v47 = vmul.f32 -1.442695, %v1577_v45 }
0x1765   :  { %2118 = vpow2.f32 %v1721_v47 }
0x176d   :  { %v2117_v9 = vpop.eup %2116 }
0x176e   :  { %1587 = vrot.lane.b32.xlu0 %v2117_v9, %s2251_s22 }
0x176f   :  { %v2119_v48 = vpop.eup %2118 }
0x1770   :  { %v1581_v49 = vadd.f32 1.0, %v2119_v48 }
0x1772   :  { %2120 = vrcp.f32 %v1581_v49 }
0x177c   :  { %v2121_v16 = vpop.eup %2120 }
0x177d   :  { %v1585_v51 = vmul.f32 %v2121_v16, %v1444_v7 }
0x17e0   :  { %v1588_v18 = vpop.permute.xlu0 %1587 }
0x17e1   :  { %v1590_v50 = vmul.f32 %v2121_v16, %v1588_v18 }
0x17e3   :  { %1592 = vrot.lane.b32.xlu1 %v1590_v50, %s2252_s2 }
0x1855   :  { %v1593_v52 = vpop.permute.xlu1 %1592 }
0x1856   :  { %v1595_v53 = vadd.f32 %v1593_v52, %v1585_v51 }
0x1858   :  { %2122 = vtanh.f32 %v1595_v53 }
0x1862   :  { %v2123_v59 = vpop.eup %2122 }
0x1863   :  { %1598 = vrot.lane.b32.xlu0 %v2123_v59, %s2251_s22 }
0x18d5   :  { %v1599_v60 = vpop.permute.xlu0 %1598 }
0x18d6   :  { %v1601_v61 = vmul.f32 %v2121_v16, %v1599_v60 }
0x18d8   :  { %v1602_v34 = vpack.c.bf16 %v1601_v61, %v1601_v61 }
0x18da   :  { %1617 = vrot.lane.b32.xlu1 %v1602_v34, %s2252_s2 }
0x194c   :  { %v1618_v62 = vpop.permute.xlu1 %1617 }
0x194d   :  { %1982 = vmatmul.mubr.msk.bf16.vlgmr.msra.gmra.mrb[44].mxu1 %vm195_vm2, %v1618_v62 }
0x1a20   :  { %v1656_v12 = vpop.f32.mrb[44].mxu1 }
0x1a21   :  { %v1657_v0 = vadd.f32 %v1722_v63, %v1656_v12  ;;  %v1983_v2 = vpop.f32.mrb[45].mxu1 }
0x1a22   :  { %v1659_v3 = vpop.f32.mrb[46].mxu1 }
0x1a23   :  { %v1984_v1 = vpop.f32.mrb[47].mxu1  ;;  %1663 = vst.msk [vmem:[#allocation10] sm:$0x3] %vm1662_vm3, %v1657_v0 }
0x1a24   :  { %2224 = shalt.err (!%p2221_p8)
}
0x1a25   :  { %s2225_s8 = scalar_lea.hbm %s2746_s9, 32 }
0x1a26   :  { %p2226_p9 = scmp.ne.s32.totalorder %s2746_s9, %s2225_s8  ;;  %p2229_p10 = scmp.lt.u32.totalorder %s2225_s8, %s2746_s9 }
0x1a28   :  { %p2231_p11 = pnand %p2229_p10, %p2226_p9 }
0x1a2a   :  { %2234 = shalt.err (!%p2231_p11)
}
0x1a2b   :  { %1673 = dma.vmem_to_hbm [thread:$0]  %s1671_s4, 32, %s2746_s9, [#allocation4]  }
0x1a2c   :  { %2241 = dma.done.wait [#allocation4], 32  }
0x1a2d   :  { %2242 = vsyncadd [#allocation4], 4294967264 }
0x1a2e   :  { %1677 = vsyncpa [#allocation3], 1 }
0x1a2f   :  { %1678 = vsyncpa [#allocation6], 1 }
0x1a30   :  { %1679 = vsyncpa [#allocation9], 1 }
0x1a31   :  { %1680 = vsyncpa [#allocation4], 1 }

</bundles_post_ra>
